<compile_context>
chip_gen: v6e
topology: v6e:2x2x1
jax: 0.10.0
libtpu: 0.0.40
codegen_flags: <defaults>
</compile_context>

<pallas_src>
import functools

import jax
import jax.numpy as jnp
import numpy as np
from jax import lax
from jax.experimental import pallas as pl
from jax.experimental.pallas import tpu as pltpu


def _wssa_kernel(x_ref, u_ref, pos_ref, wqkv_ref, wr_ref, wo_ref,
                 rwb_ref, rrb_ref, bo_ref, out_ref, *, n_head, d_head, scale):
    """One batch element of relative-position self-attention (all heads fused)."""
    f32 = jnp.float32
    bf16 = jnp.bfloat16
    _, L, Dm = x_ref.shape
    H, Dh = n_head, d_head
    HD = H * Dh

    x = x_ref[0]                                                     # (L, Dm) bf16

    # Fused projections over all heads (single wide MXU matmuls, f32 accumulate).
    qkv = jnp.dot(x, wqkv_ref[...], preferred_element_type=f32)     # (L, 3*H*Dh)
    qkv = qkv + u_ref[0].astype(f32)                                 # + u1ss
    r = jnp.dot(pos_ref[...], wr_ref[...],
                preferred_element_type=f32).astype(bf16)             # (L, H*Dh)

    q = qkv[:, :HD]                                                  # (L, H*Dh) f32
    k = qkv[:, HD:2 * HD].astype(bf16)
    v = qkv[:, 2 * HD:].astype(bf16)

    # Relative-position biases + softmax scale folded into q (on (L, H*Dh),
    # not on the (L, L) score).
    q_rw = ((q + rwb_ref[...].astype(f32)) * scale).astype(bf16)
    q_rr = ((q + rrb_ref[...].astype(f32)) * scale).astype(bf16)

    row = lax.broadcasted_iota(jnp.int32, (L, L), 0)
    col = lax.broadcasted_iota(jnp.int32, (L, L), 1)
    causal = col <= row     # mems=None -> mlen=0; local_size=None -> no band mask

    dn = (((1,), (1,)), ((), ()))        # contract head dim of both operands
    heads = []
    for h in range(H):                    # H is small; only (L,L) work is per-head
        sl = slice(h * Dh, (h + 1) * Dh)
        ac = lax.dot_general(q_rw[:, sl], k[:, sl], dn,
                             preferred_element_type=f32)             # (L, L)
        bd = lax.dot_general(q_rr[:, sl], r[:, sl], dn,
                             preferred_element_type=f32)             # (L, L)
        # Transformer-XL rel-shift: need bd[i, j] <- bd[i, (j - i - 1) mod L].
        # pos was pre-rolled by one row in the wrapper (accounts for the "-1"),
        # so a single strided XLU roll of amount i per row finishes the shift.
        # Only j <= i survives the causal mask, where this matches the
        # reference pad/reshape rel_shift exactly.
        bd = pltpu.roll(bd, 0, 1, stride=1, stride_axis=0)
        score = jnp.where(causal, ac + bd, -jnp.inf)                  # scale already in q

        # Softmax in f32; divide via the EUP approximate reciprocal.
        m = jnp.max(score, axis=-1, keepdims=True)
        e = jnp.exp(score - m)
        prob = e * pl.reciprocal(jnp.sum(e, axis=-1, keepdims=True), approx=True)

        heads.append(jnp.dot(prob.astype(bf16), v[:, sl],
                             preferred_element_type=f32).astype(bf16))  # (L, Dh)

    attn = jnp.concatenate(heads, axis=1)                            # (L, H*Dh) bf16
    y = jnp.dot(attn, wo_ref[...], preferred_element_type=f32)       # (L, Dm)
    y = y + bo_ref[...] + x.astype(f32)                              # o_net bias + residual

    # Post-LayerNorm over d_model (eps=1e-5, no affine).
    mu = jnp.mean(y, axis=-1, keepdims=True)
    var = jnp.mean((y - mu) ** 2, axis=-1, keepdims=True)
    out_ref[0] = ((y - mu) * lax.rsqrt(var + 1e-5)).astype(out_ref.dtype)


def weight_share_self_attention(z1ss, pos_emb, u1ss, params, n_head, d_head):
    """z1ss: (B, d_model, L), pos_emb: (1, d_model, L), u1ss: (B, 3*H*Dh, L)."""
    B, Dm, L = z1ss.shape
    H, Dh = n_head, d_head
    HD = H * Dh
    cdt = jnp.bfloat16

    # (seq, feature)-last layouts; bf16 operands to halve HBM traffic.
    x = jnp.transpose(z1ss, (0, 2, 1)).astype(cdt)                    # (B, L, Dm)
    u = jnp.transpose(u1ss, (0, 2, 1)).astype(cdt)                    # (B, L, 3*HD)
    # Pre-roll pos by one position: together with the in-kernel strided roll of
    # amount i per row this realizes the (j - i - 1) rel-shift with per-row
    # amounts strictly < L.
    pos = jnp.roll(jnp.transpose(pos_emb[0], (1, 0)), 1, axis=0).astype(cdt)  # (L, Dm)
    wqkv = jnp.transpose(params["w_qkv"], (1, 0)).astype(cdt)         # (Dm, 3*HD)
    wr = jnp.transpose(params["w_r"], (1, 0)).astype(cdt)             # (Dm, HD)
    wo = jnp.transpose(params["w_o"], (1, 0)).astype(cdt)             # (HD, Dm)
    rwb = params["r_w_bias"].reshape(1, HD).astype(jnp.float32)
    rrb = params["r_r_bias"].reshape(1, HD).astype(jnp.float32)
    bo = params["b_o"].reshape(1, Dm).astype(jnp.float32)

    kernel = functools.partial(_wssa_kernel, n_head=H, d_head=Dh,
                               scale=1.0 / d_head ** 0.5)

    out = pl.pallas_call(
        kernel,
        out_shape=jax.ShapeDtypeStruct((B, L, Dm), jnp.float32),
        grid_spec=pltpu.PrefetchScalarGridSpec(
            num_scalar_prefetch=0,
            grid=(B,),                                   # batch only; heads fused
            in_specs=[
                pl.BlockSpec((1, L, Dm), lambda b: (b, 0, 0)),        # x
                pl.BlockSpec((1, L, 3 * HD), lambda b: (b, 0, 0)),    # u1ss
                pl.BlockSpec((L, Dm), lambda b: (0, 0)),              # pos (resident)
                pl.BlockSpec((Dm, 3 * HD), lambda b: (0, 0)),         # Wqkv (resident)
                pl.BlockSpec((Dm, HD), lambda b: (0, 0)),             # Wr (resident)
                pl.BlockSpec((HD, Dm), lambda b: (0, 0)),             # Wo (resident)
                pl.BlockSpec((1, HD), lambda b: (0, 0)),              # r_w_bias
                pl.BlockSpec((1, HD), lambda b: (0, 0)),              # r_r_bias
                pl.BlockSpec((1, Dm), lambda b: (0, 0)),              # b_o
            ],
            out_specs=pl.BlockSpec((1, L, Dm), lambda b: (b, 0, 0)),
        ),
        compiler_params=pltpu.CompilerParams(
            dimension_semantics=("parallel",),           # megacore-shard batch (v7x)
            vmem_limit_bytes=32 * 1024 * 1024,           # tiny tiles; re-derive if L grows
        ),
    )(x, u, pos, wqkv, wr, wo, rwb, rrb, bo)

    return jnp.transpose(out, (0, 2, 1))                              # (B, Dm, L)


def _reference(z1ss, pos_emb, u1ss, params, n_head, d_head):
    """Pure-JAX (f32) transcription of the PyTorch forward (mems=None, post-LN)."""
    B, Dm, L = z1ss.shape
    Dh = d_head
    scale = 1.0 / d_head ** 0.5
    w_heads = jnp.einsum("oc,bcl->bol", params["w_qkv"], z1ss) + u1ss
    r_head_k = jnp.einsum("oc,cl->ol", params["w_r"], pos_emb[0])
    q, k, v = jnp.split(w_heads, 3, axis=1)
    q = q.reshape(B, n_head, Dh, L)
    k = k.reshape(B, n_head, Dh, L)
    v = v.reshape(B, n_head, Dh, L)
    r = r_head_k.reshape(n_head, Dh, L)
    AC = jnp.einsum("bndi,bndj->bnij", q + params["r_w_bias"][None, :, :, None], k)
    BD = jnp.einsum("bndi,ndj->bnij", q + params["r_r_bias"][:, :, None], r)
    xp = jnp.pad(BD, ((0, 0), (0, 0), (0, 0), (1, 0)))
    xp = xp.reshape(B, n_head, L + 1, L)
    BD = xp[:, :, 1:, :].reshape(B, n_head, L, L)
    score = (AC + BD) * scale
    mask = np.triu(np.ones((L, L), dtype=bool), 1)   # local_size=None, L < 1000
    score = jnp.where(mask[None, None], -jnp.inf, score)
    prob = jax.nn.softmax(score, axis=-1)
    attn_vec = jnp.einsum("bnij,bndj->bndi", prob, v).reshape(B, n_head * Dh, L)
    attn_out = (jnp.einsum("oc,bcl->bol", params["w_o"], attn_vec)
                + params["b_o"][None, :, None])
    y = jnp.transpose(attn_out + z1ss, (0, 2, 1))
    mu = jnp.mean(y, axis=-1, keepdims=True)
    var = jnp.mean((y - mu) ** 2, axis=-1, keepdims=True)
    out = (y - mu) / jnp.sqrt(var + 1e-5)
    return jnp.transpose(out, (0, 2, 1))


if __name__ == "__main__":
    # Small shapes consistent with the module.  L=128 so the (L, L) attention
    # tile is vreg-lane-aligned (the strided rel-shift roll acts on full
    # 128-lane rows); the whole problem is still only a few tens of KiB.
    B, n_head, d_head, L = 2, 2, 16, 128
    d_model = 32
    HD = n_head * d_head

    key = jax.random.PRNGKey(0)
    ks = jax.random.split(key, 9)
    params = {
        "w_qkv": jax.random.normal(ks[0], (3 * HD, d_model), jnp.float32) * 0.05,
        "w_r": jax.random.normal(ks[1], (HD, d_model), jnp.float32) * 0.05,
        "r_w_bias": jax.random.uniform(ks[2], (n_head, d_head), jnp.float32,
                                       minval=-0.05, maxval=0.05),
        "r_r_bias": jax.random.uniform(ks[3], (n_head, d_head), jnp.float32,
                                       minval=-0.05, maxval=0.05),
        "w_o": jax.random.normal(ks[4], (d_model, HD), jnp.float32) * 0.05,
        "b_o": jax.random.normal(ks[5], (d_model,), jnp.float32) * 0.05,
    }
    z1ss = jax.random.normal(ks[6], (B, d_model, L), jnp.float32)
    pos_emb = jax.random.normal(ks[7], (1, d_model, L), jnp.float32)
    u1ss = jax.random.normal(ks[8], (B, 3 * HD, L), jnp.float32) * 0.1

    out = weight_share_self_attention(z1ss, pos_emb, u1ss, params,
                                      n_head, d_head)
    out = jax.block_until_ready(out)

    ref = jax.block_until_ready(
        _reference(z1ss, pos_emb, u1ss, params, n_head, d_head))
    # Tolerance reflects bf16 MXU operands (incl. the bf16-rounded residual) and
    # the approx softmax reciprocal; accumulation stays f32.
    np.testing.assert_allclose(np.asarray(out), np.asarray(ref),
                               rtol=2.5e-2, atol=2.5e-2)
    print("KERNEL_OK")
</pallas_src>

<mosaic_0001>
module attributes {stable_mosaic.version = 11 : i64} {
  func.func @_wssa_kernel(%arg0: i32, %arg1: memref<1x128x32xbf16, #tpu.memory_space<vmem>>, %arg2: memref<1x128x96xbf16, #tpu.memory_space<vmem>>, %arg3: memref<128x32xbf16, #tpu.memory_space<vmem>>, %arg4: memref<32x96xbf16, #tpu.memory_space<vmem>>, %arg5: memref<32x32xbf16, #tpu.memory_space<vmem>>, %arg6: memref<32x32xbf16, #tpu.memory_space<vmem>>, %arg7: memref<1x32xf32, #tpu.memory_space<vmem>>, %arg8: memref<1x32xf32, #tpu.memory_space<vmem>>, %arg9: memref<1x32xf32, #tpu.memory_space<vmem>>, %arg10: memref<1x128x32xf32, #tpu.memory_space<vmem>>) attributes {dimension_semantics = [#tpu.dimension_semantics<parallel>], iteration_bounds = array<i64: 2>, scalar_prefetch = 0 : i64, scratch_operands = 0 : i64, tpu.core_type = #tpu.core_type<tc>, window_params = [{transform_indices = @transform_0, window_bounds = array<i64: 1, 128, 32>}, {transform_indices = @transform_1, window_bounds = array<i64: 1, 128, 96>}, {pipeline_mode = #tpu.pipeline_mode<synchronous>, transform_indices = @transform_2, window_bounds = array<i64: 128, 32>}, {pipeline_mode = #tpu.pipeline_mode<synchronous>, transform_indices = @transform_3, window_bounds = array<i64: 32, 96>}, {pipeline_mode = #tpu.pipeline_mode<synchronous>, transform_indices = @transform_4, window_bounds = array<i64: 32, 32>}, {pipeline_mode = #tpu.pipeline_mode<synchronous>, transform_indices = @transform_5, window_bounds = array<i64: 32, 32>}, {pipeline_mode = #tpu.pipeline_mode<synchronous>, transform_indices = @transform_6, window_bounds = array<i64: 1, 32>}, {pipeline_mode = #tpu.pipeline_mode<synchronous>, transform_indices = @transform_7, window_bounds = array<i64: 1, 32>}, {pipeline_mode = #tpu.pipeline_mode<synchronous>, transform_indices = @transform_8, window_bounds = array<i64: 1, 32>}, {transform_indices = @transform_9, window_bounds = array<i64: 1, 128, 32>}]} {
    %c0 = arith.constant 0 : index
    %c0_0 = arith.constant 0 : index
    %c0_1 = arith.constant 0 : index
    %0 = vector.load %arg1[%c0, %c0_0, %c0_1] : memref<1x128x32xbf16, #tpu.memory_space<vmem>>, vector<1x128x32xbf16>
    %1 = vector.shape_cast %0 : vector<1x128x32xbf16> to vector<128x32xbf16>
    %c0_2 = arith.constant 0 : index
    %c0_3 = arith.constant 0 : index
    %2 = vector.load %arg4[%c0_2, %c0_3] : memref<32x96xbf16, #tpu.memory_space<vmem>>, vector<32x96xbf16>
    %cst = arith.constant dense<0.000000e+00> : vector<128x96xf32>
    %3 = tpu.matmul %1, %2, %cst {dimension_numbers = #tpu.dot_dimension_numbers<[1], [0], [0], [1], [0, 0, 1, 1], [], []>} : vector<128x32xbf16>, vector<32x96xbf16>, vector<128x96xf32> -> vector<128x96xf32>
    %c0_4 = arith.constant 0 : index
    %c0_5 = arith.constant 0 : index
    %c0_6 = arith.constant 0 : index
    %4 = vector.load %arg2[%c0_4, %c0_5, %c0_6] : memref<1x128x96xbf16, #tpu.memory_space<vmem>>, vector<1x128x96xbf16>
    %5 = vector.shape_cast %4 : vector<1x128x96xbf16> to vector<128x96xbf16>
    %6 = arith.extf %5 : vector<128x96xbf16> to vector<128x96xf32>
    %7 = arith.addf %3, %6 : vector<128x96xf32>
    %c0_7 = arith.constant 0 : index
    %c0_8 = arith.constant 0 : index
    %8 = vector.load %arg3[%c0_7, %c0_8] : memref<128x32xbf16, #tpu.memory_space<vmem>>, vector<128x32xbf16>
    %c0_9 = arith.constant 0 : index
    %c0_10 = arith.constant 0 : index
    %9 = vector.load %arg5[%c0_9, %c0_10] : memref<32x32xbf16, #tpu.memory_space<vmem>>, vector<32x32xbf16>
    %cst_11 = arith.constant dense<0.000000e+00> : vector<128x32xf32>
    %10 = tpu.matmul %8, %9, %cst_11 {dimension_numbers = #tpu.dot_dimension_numbers<[1], [0], [0], [1], [0, 0, 1, 1], [], []>} : vector<128x32xbf16>, vector<32x32xbf16>, vector<128x32xf32> -> vector<128x32xf32>
    %11 = arith.truncf %10 : vector<128x32xf32> to vector<128x32xbf16>
    %12 = vector.extract_strided_slice %7 {offsets = [0, 0], sizes = [128, 32], strides = [1, 1]} : vector<128x96xf32> to vector<128x32xf32>
    %13 = vector.extract_strided_slice %7 {offsets = [0, 32], sizes = [128, 32], strides = [1, 1]} : vector<128x96xf32> to vector<128x32xf32>
    %14 = arith.truncf %13 : vector<128x32xf32> to vector<128x32xbf16>
    %15 = vector.extract_strided_slice %7 {offsets = [0, 64], sizes = [128, 32], strides = [1, 1]} : vector<128x96xf32> to vector<128x32xf32>
    %16 = arith.truncf %15 : vector<128x32xf32> to vector<128x32xbf16>
    %c0_12 = arith.constant 0 : index
    %c0_13 = arith.constant 0 : index
    %17 = vector.load %arg7[%c0_12, %c0_13] : memref<1x32xf32, #tpu.memory_space<vmem>>, vector<1x32xf32>
    %18 = vector.broadcast %17 : vector<1x32xf32> to vector<128x32xf32>
    %19 = arith.addf %12, %18 : vector<128x32xf32>
    %cst_14 = arith.constant 2.500000e-01 : f32
    %20 = vector.broadcast %cst_14 : f32 to vector<128x32xf32>
    %21 = arith.mulf %19, %20 : vector<128x32xf32>
    %22 = arith.truncf %21 : vector<128x32xf32> to vector<128x32xbf16>
    %c0_15 = arith.constant 0 : index
    %c0_16 = arith.constant 0 : index
    %23 = vector.load %arg8[%c0_15, %c0_16] : memref<1x32xf32, #tpu.memory_space<vmem>>, vector<1x32xf32>
    %24 = vector.broadcast %23 : vector<1x32xf32> to vector<128x32xf32>
    %25 = arith.addf %12, %24 : vector<128x32xf32>
    %cst_17 = arith.constant 2.500000e-01 : f32
    %26 = vector.broadcast %cst_17 : f32 to vector<128x32xf32>
    %27 = arith.mulf %25, %26 : vector<128x32xf32>
    %28 = arith.truncf %27 : vector<128x32xf32> to vector<128x32xbf16>
    %29 = tpu.iota {dimensions = array<i32: 0>} : vector<128x128xi32>
    %30 = tpu.iota {dimensions = array<i32: 1>} : vector<128x128xi32>
    %31 = arith.cmpi sle, %30, %29 : vector<128x128xi32>
    %32 = vector.extract_strided_slice %22 {offsets = [0, 0], sizes = [128, 16], strides = [1, 1]} : vector<128x32xbf16> to vector<128x16xbf16>
    %33 = vector.extract_strided_slice %14 {offsets = [0, 0], sizes = [128, 16], strides = [1, 1]} : vector<128x32xbf16> to vector<128x16xbf16>
    %cst_18 = arith.constant dense<0.000000e+00> : vector<128x128xf32>
    %34 = tpu.matmul %32, %33, %cst_18 {dimension_numbers = #tpu.dot_dimension_numbers<[1], [1], [0], [0], [0, 0, 1, 0], [], []>} : vector<128x16xbf16>, vector<128x16xbf16>, vector<128x128xf32> -> vector<128x128xf32>
    %35 = vector.extract_strided_slice %28 {offsets = [0, 0], sizes = [128, 16], strides = [1, 1]} : vector<128x32xbf16> to vector<128x16xbf16>
    %36 = vector.extract_strided_slice %11 {offsets = [0, 0], sizes = [128, 16], strides = [1, 1]} : vector<128x32xbf16> to vector<128x16xbf16>
    %cst_19 = arith.constant dense<0.000000e+00> : vector<128x128xf32>
    %37 = tpu.matmul %35, %36, %cst_19 {dimension_numbers = #tpu.dot_dimension_numbers<[1], [1], [0], [0], [0, 0, 1, 0], [], []>} : vector<128x16xbf16>, vector<128x16xbf16>, vector<128x128xf32> -> vector<128x128xf32>
    %c0_i32 = arith.constant 0 : i32
    %38 = tpu.dynamic_rotate %37 by %c0_i32 dim 1 {stride = 1 : si32, stride_dimension = 0 : si32} : vector<128x128xf32>, i32 -> vector<128x128xf32>
    %39 = arith.addf %34, %38 : vector<128x128xf32>
    %cst_20 = arith.constant 0xFF800000 : f32
    %40 = vector.broadcast %cst_20 : f32 to vector<128x128xf32>
    %41 = arith.select %31, %39, %40 : vector<128x128xi1>, vector<128x128xf32>
    %cst_21 = arith.constant dense<0xFF800000> : vector<128xf32>
    %42 = vector.multi_reduction <maximumf>, %41, %cst_21 [1] : vector<128x128xf32> to vector<128xf32>
    %43 = vector.shape_cast %42 : vector<128xf32> to vector<128x1xf32>
    %44 = vector.broadcast %43 : vector<128x1xf32> to vector<128x128xf32>
    %45 = arith.subf %41, %44 : vector<128x128xf32>
    %46 = math.exp %45 : vector<128x128xf32>
    %cst_22 = arith.constant dense<0.000000e+00> : vector<128xf32>
    %47 = vector.multi_reduction <add>, %46, %cst_22 [1] : vector<128x128xf32> to vector<128xf32>
    %48 = vector.shape_cast %47 : vector<128xf32> to vector<128x1xf32>
    %49 = tpu.reciprocal %48 {approx = true} : vector<128x1xf32> -> vector<128x1xf32>
    %50 = vector.broadcast %49 : vector<128x1xf32> to vector<128x128xf32>
    %51 = arith.mulf %46, %50 : vector<128x128xf32>
    %52 = arith.truncf %51 : vector<128x128xf32> to vector<128x128xbf16>
    %53 = vector.extract_strided_slice %16 {offsets = [0, 0], sizes = [128, 16], strides = [1, 1]} : vector<128x32xbf16> to vector<128x16xbf16>
    %cst_23 = arith.constant dense<0.000000e+00> : vector<128x16xf32>
    %54 = tpu.matmul %52, %53, %cst_23 {dimension_numbers = #tpu.dot_dimension_numbers<[1], [0], [0], [1], [0, 0, 1, 1], [], []>} : vector<128x128xbf16>, vector<128x16xbf16>, vector<128x16xf32> -> vector<128x16xf32>
    %55 = arith.truncf %54 : vector<128x16xf32> to vector<128x16xbf16>
    %56 = vector.extract_strided_slice %22 {offsets = [0, 16], sizes = [128, 16], strides = [1, 1]} : vector<128x32xbf16> to vector<128x16xbf16>
    %57 = vector.extract_strided_slice %14 {offsets = [0, 16], sizes = [128, 16], strides = [1, 1]} : vector<128x32xbf16> to vector<128x16xbf16>
    %cst_24 = arith.constant dense<0.000000e+00> : vector<128x128xf32>
    %58 = tpu.matmul %56, %57, %cst_24 {dimension_numbers = #tpu.dot_dimension_numbers<[1], [1], [0], [0], [0, 0, 1, 0], [], []>} : vector<128x16xbf16>, vector<128x16xbf16>, vector<128x128xf32> -> vector<128x128xf32>
    %59 = vector.extract_strided_slice %28 {offsets = [0, 16], sizes = [128, 16], strides = [1, 1]} : vector<128x32xbf16> to vector<128x16xbf16>
    %60 = vector.extract_strided_slice %11 {offsets = [0, 16], sizes = [128, 16], strides = [1, 1]} : vector<128x32xbf16> to vector<128x16xbf16>
    %cst_25 = arith.constant dense<0.000000e+00> : vector<128x128xf32>
    %61 = tpu.matmul %59, %60, %cst_25 {dimension_numbers = #tpu.dot_dimension_numbers<[1], [1], [0], [0], [0, 0, 1, 0], [], []>} : vector<128x16xbf16>, vector<128x16xbf16>, vector<128x128xf32> -> vector<128x128xf32>
    %c0_i32_26 = arith.constant 0 : i32
    %62 = tpu.dynamic_rotate %61 by %c0_i32_26 dim 1 {stride = 1 : si32, stride_dimension = 0 : si32} : vector<128x128xf32>, i32 -> vector<128x128xf32>
    %63 = arith.addf %58, %62 : vector<128x128xf32>
    %cst_27 = arith.constant 0xFF800000 : f32
    %64 = vector.broadcast %cst_27 : f32 to vector<128x128xf32>
    %65 = arith.select %31, %63, %64 : vector<128x128xi1>, vector<128x128xf32>
    %cst_28 = arith.constant dense<0xFF800000> : vector<128xf32>
    %66 = vector.multi_reduction <maximumf>, %65, %cst_28 [1] : vector<128x128xf32> to vector<128xf32>
    %67 = vector.shape_cast %66 : vector<128xf32> to vector<128x1xf32>
    %68 = vector.broadcast %67 : vector<128x1xf32> to vector<128x128xf32>
    %69 = arith.subf %65, %68 : vector<128x128xf32>
    %70 = math.exp %69 : vector<128x128xf32>
    %cst_29 = arith.constant dense<0.000000e+00> : vector<128xf32>
    %71 = vector.multi_reduction <add>, %70, %cst_29 [1] : vector<128x128xf32> to vector<128xf32>
    %72 = vector.shape_cast %71 : vector<128xf32> to vector<128x1xf32>
    %73 = tpu.reciprocal %72 {approx = true} : vector<128x1xf32> -> vector<128x1xf32>
    %74 = vector.broadcast %73 : vector<128x1xf32> to vector<128x128xf32>
    %75 = arith.mulf %70, %74 : vector<128x128xf32>
    %76 = arith.truncf %75 : vector<128x128xf32> to vector<128x128xbf16>
    %77 = vector.extract_strided_slice %16 {offsets = [0, 16], sizes = [128, 16], strides = [1, 1]} : vector<128x32xbf16> to vector<128x16xbf16>
    %cst_30 = arith.constant dense<0.000000e+00> : vector<128x16xf32>
    %78 = tpu.matmul %76, %77, %cst_30 {dimension_numbers = #tpu.dot_dimension_numbers<[1], [0], [0], [1], [0, 0, 1, 1], [], []>} : vector<128x128xbf16>, vector<128x16xbf16>, vector<128x16xf32> -> vector<128x16xf32>
    %79 = arith.truncf %78 : vector<128x16xf32> to vector<128x16xbf16>
    %80 = tpu.concatenate %55, %79 in 1 : vector<128x16xbf16>, vector<128x16xbf16> -> vector<128x32xbf16>
    %c0_31 = arith.constant 0 : index
    %c0_32 = arith.constant 0 : index
    %81 = vector.load %arg6[%c0_31, %c0_32] : memref<32x32xbf16, #tpu.memory_space<vmem>>, vector<32x32xbf16>
    %cst_33 = arith.constant dense<0.000000e+00> : vector<128x32xf32>
    %82 = tpu.matmul %80, %81, %cst_33 {dimension_numbers = #tpu.dot_dimension_numbers<[1], [0], [0], [1], [0, 0, 1, 1], [], []>} : vector<128x32xbf16>, vector<32x32xbf16>, vector<128x32xf32> -> vector<128x32xf32>
    %c0_34 = arith.constant 0 : index
    %c0_35 = arith.constant 0 : index
    %83 = vector.load %arg9[%c0_34, %c0_35] : memref<1x32xf32, #tpu.memory_space<vmem>>, vector<1x32xf32>
    %84 = vector.broadcast %83 : vector<1x32xf32> to vector<128x32xf32>
    %85 = arith.addf %82, %84 : vector<128x32xf32>
    %86 = arith.extf %1 : vector<128x32xbf16> to vector<128x32xf32>
    %87 = arith.addf %85, %86 : vector<128x32xf32>
    %cst_36 = arith.constant dense<0.000000e+00> : vector<128xf32>
    %88 = vector.multi_reduction <add>, %87, %cst_36 [1] : vector<128x32xf32> to vector<128xf32>
    %89 = vector.shape_cast %88 : vector<128xf32> to vector<128x1xf32>
    %cst_37 = arith.constant 3.200000e+01 : f32
    %90 = vector.broadcast %cst_37 : f32 to vector<128x1xf32>
    %91 = arith.divf %89, %90 : vector<128x1xf32>
    %92 = vector.broadcast %91 : vector<128x1xf32> to vector<128x32xf32>
    %93 = arith.subf %87, %92 : vector<128x32xf32>
    %94 = arith.mulf %93, %93 : vector<128x32xf32>
    %cst_38 = arith.constant dense<0.000000e+00> : vector<128xf32>
    %95 = vector.multi_reduction <add>, %94, %cst_38 [1] : vector<128x32xf32> to vector<128xf32>
    %96 = vector.shape_cast %95 : vector<128xf32> to vector<128x1xf32>
    %cst_39 = arith.constant 3.200000e+01 : f32
    %97 = vector.broadcast %cst_39 : f32 to vector<128x1xf32>
    %98 = arith.divf %96, %97 : vector<128x1xf32>
    %99 = vector.broadcast %91 : vector<128x1xf32> to vector<128x32xf32>
    %100 = arith.subf %87, %99 : vector<128x32xf32>
    %cst_40 = arith.constant 9.99999974E-6 : f32
    %101 = vector.broadcast %cst_40 : f32 to vector<128x1xf32>
    %102 = arith.addf %98, %101 : vector<128x1xf32>
    %103 = math.rsqrt %102 : vector<128x1xf32>
    %104 = vector.broadcast %103 : vector<128x1xf32> to vector<128x32xf32>
    %105 = arith.mulf %100, %104 : vector<128x32xf32>
    %c0_41 = arith.constant 0 : index
    %c0_42 = arith.constant 0 : index
    %c0_43 = arith.constant 0 : index
    %106 = vector.load %arg10[%c0_41, %c0_42, %c0_43] : memref<1x128x32xf32, #tpu.memory_space<vmem>>, vector<1x128x32xf32>
    %107 = vector.shape_cast %106 : vector<1x128x32xf32> to vector<128x32xf32>
    %108 = vector.shape_cast %105 : vector<128x32xf32> to vector<1x128x32xf32>
    tpu.vector_store %arg10[%c0_41, %c0_42, %c0_43], %108 {strides = array<i32>} : memref<1x128x32xf32, #tpu.memory_space<vmem>>, vector<1x128x32xf32>,
    return
  }
  func.func @transform_0(%arg0: i32) -> (i32, i32, i32) {
    %c0_i32 = arith.constant 0 : i32
    %c0_i32_0 = arith.constant 0 : i32
    %c0_i32_1 = arith.constant 0 : i32
    return %arg0, %c0_i32, %c0_i32_0 : i32, i32, i32
  }
  func.func @transform_1(%arg0: i32) -> (i32, i32, i32) {
    %c0_i32 = arith.constant 0 : i32
    %c0_i32_0 = arith.constant 0 : i32
    %c0_i32_1 = arith.constant 0 : i32
    return %arg0, %c0_i32, %c0_i32_0 : i32, i32, i32
  }
  func.func @transform_2(%arg0: i32) -> (i32, i32) {
    %c0_i32 = arith.constant 0 : i32
    %c0_i32_0 = arith.constant 0 : i32
    %c0_i32_1 = arith.constant 0 : i32
    return %c0_i32, %c0_i32_0 : i32, i32
  }
  func.func @transform_3(%arg0: i32) -> (i32, i32) {
    %c0_i32 = arith.constant 0 : i32
    %c0_i32_0 = arith.constant 0 : i32
    %c0_i32_1 = arith.constant 0 : i32
    return %c0_i32, %c0_i32_0 : i32, i32
  }
  func.func @transform_4(%arg0: i32) -> (i32, i32) {
    %c0_i32 = arith.constant 0 : i32
    %c0_i32_0 = arith.constant 0 : i32
    %c0_i32_1 = arith.constant 0 : i32
    return %c0_i32, %c0_i32_0 : i32, i32
  }
  func.func @transform_5(%arg0: i32) -> (i32, i32) {
    %c0_i32 = arith.constant 0 : i32
    %c0_i32_0 = arith.constant 0 : i32
    %c0_i32_1 = arith.constant 0 : i32
    return %c0_i32, %c0_i32_0 : i32, i32
  }
  func.func @transform_6(%arg0: i32) -> (i32, i32) {
    %c0_i32 = arith.constant 0 : i32
    %c0_i32_0 = arith.constant 0 : i32
    %c0_i32_1 = arith.constant 0 : i32
    return %c0_i32, %c0_i32_0 : i32, i32
  }
  func.func @transform_7(%arg0: i32) -> (i32, i32) {
    %c0_i32 = arith.constant 0 : i32
    %c0_i32_0 = arith.constant 0 : i32
    %c0_i32_1 = arith.constant 0 : i32
    return %c0_i32, %c0_i32_0 : i32, i32
  }
  func.func @transform_8(%arg0: i32) -> (i32, i32) {
    %c0_i32 = arith.constant 0 : i32
    %c0_i32_0 = arith.constant 0 : i32
    %c0_i32_1 = arith.constant 0 : i32
    return %c0_i32, %c0_i32_0 : i32, i32
  }
  func.func @transform_9(%arg0: i32) -> (i32, i32, i32) {
    %c0_i32 = arith.constant 0 : i32
    %c0_i32_0 = arith.constant 0 : i32
    %c0_i32_1 = arith.constant 0 : i32
    return %arg0, %c0_i32, %c0_i32_0 : i32, i32, i32
  }
}

</mosaic_0001>

<bundles_post_ra>
// kernel: tpu_custom_call.1
= control target key start
LH: loop header
LB: loop body
LE: loop exit
PB: predicated region body
PF: predicated region fallthrough
CT: control target
= control target key end

     0   :  { %s3697_s30 = smov 0   ;;  %s5003_s0 = inlined_call_operand.vmem [shape: bf16[2,128,32], index: 0, kind: input, shape index: {}]   ;;  %s5004_s1 = inlined_call_operand.vmem [shape: bf16[2,128,96], index: 1, kind: input, shape index: {}]   ;;  %s5005_s2 = inlined_call_operand.vmem [shape: bf16[128,32], index: 2, kind: input, shape index: {}]   ;;  %s5006_s3 = inlined_call_operand.vmem [shape: bf16[32,96], index: 3, kind: input, shape index: {}]   ;;  %s5007_s4 = inlined_call_operand.vmem [shape: bf16[32,32], index: 4, kind: input, shape index: {}]   ;;  %s5008_s5 = inlined_call_operand.vmem [shape: bf16[32,32], index: 5, kind: input, shape index: {}]   ;;  %s5009_s6 = inlined_call_operand.vmem [shape: f32[1,32], index: 6, kind: input, shape index: {}]   ;;  %s5010_s7 = inlined_call_operand.vmem [shape: f32[1,32], index: 7, kind: input, shape index: {}]   ;;  %s5011_s8 = inlined_call_operand.vmem [shape: f32[1,32], index: 8, kind: input, shape index: {}]   ;;  %s5012_s9 = inlined_call_operand.vmem [shape: f32[2,128,32], index: 9, kind: output, shape index: {}]  }
   0x1 LB: > { %s2839_s10 = sadd.s32 4294967295, %s3623_s30   ;;  %p2843_p0 = scmp.ge.s32.totalorder %s3623_s30, 1  ;;  %s3623_s30 = sphi %s3697_s30, %s19_s30  }
   0x2   : > { %p297_p1 = scmp.lt.s32.totalorder %s3623_s30, 3 }
   0x4   : > { %p298_p2 = pnand %p2843_p0, %p297_p1 }
   0x6   : > { %301 = sbr.rel (%p298_p2) target bundleno = 2469 (0x9a5), region = 56 }
   0xb   : > { %v3419_v0 = vld [vmem:[%s5006_s3 + $0x8] sm:$0xff]   ;;  %p338_p3 = scmp.lt.s32.totalorder %s2839_s10, 1  ;;  %v3421_v2 = vld [vmem:[%s5006_s3] sm:$0xff]   ;;  %vm5013_vm0 = vcmask 261120   ;;  %v3428_v9 = vld [vmem:[%s5005_s2 + $0x10] sm:$0xff]   ;;  %vm918_vm1 = vcmask 130048  }
   0xc   : > { %v3420_v1 = vld [vmem:[%s5007_s4 + $0x8] sm:$0xff]   ;;  %3101 = vmatprep.subr.bf16.mxu0 %v3419_v0  ;;  %v3422_v3 = vld [vmem:[%s5007_s4] sm:$0xff]   ;;  %v3430_v12 = vld [vmem:[%s5005_s2 + $0x18] sm:$0xff]   ;;  %s3625_s28 = smov 96   ;;  %s3626_s29 = smov 112  }
   0xd   : > { %s5094_s10 = smov (!%p338_p3, %s2839_s10), 1  ;;  %3121 = vmatprep.subr.bf16.mxu1 %v3420_v1  ;;  %3102 = vmatpush3.bf16.msra.mxu0 %v3419_v0  ;;  %v3424_v4 = vld [vmem:[%s5005_s2] sm:$0xff]   ;;  %v3426_v7 = vld [vmem:[%s5005_s2 + $0x8] sm:$0xff]   ;;  %v3436_v17 = vld [vmem:[%s5005_s2 + $0x30] sm:$0xff]   ;;  %s3627_s11 = smov 64  }
   0xe   : > { %3122 = vmatpush3.bf16.msra.mxu1 %v3420_v1  ;;  %3103 = vmatprep.subr.bf16.mxu0 %v3421_v2  ;;  %s2933_s19 = sshll.u32 %s5094_s10, 6  ;;  %v3432_v13 = vld [vmem:[%s5005_s2 + $0x20] sm:$0xff]   ;;  %v3434_v16 = vld [vmem:[%s5005_s2 + $0x28] sm:$0xff]   ;;  %v3438_v19 = vld [vmem:[%s5005_s2 + $0x38] sm:$0xff]   ;;  %s3628_s12 = smov 80  }
   0xf   : > { %3123 = vmatprep.subr.bf16.mxu1 %v3422_v3  ;;  %s3725_s22 = scalar_lea.vmem %s5003_s0, %s2933_s19  ;;  %3125 = vmatprep.mubr.msk.bf16.mxu1 %vm5013_vm0, %v3424_v4  ;;  %s3780_s24 = scalar_lea.vmem %s5004_s1, %s2933_s19  ;;  %v3787_v25 = vld [vmem:[%s5009_s6] ss:$0 sm:$0xff] }
  0x10   : > { %v354_v5 = vld [vmem:[%s3725_s22] sm:$0xff]   ;;  %v356_v6 = vld [vmem:[%s3725_s22 + $0x8] sm:$0xff]   ;;  %v358_v8 = vld [vmem:[%s3725_s22 + $0x10] sm:$0xff]   ;;  %s3629_s13 = smov 272   ;;  %s3630_s14 = smov 256  }
  0x11   : > { %3104 = vmatpush3.bf16.msra.mxu0 %v3421_v2  ;;  %3105 = vmatprep.mubr.msk.bf16.mxu0 %vm5013_vm0, %v354_v5  ;;  %v360_v10 = vld [vmem:[%s3725_s22 + $0x18] sm:$0xff]   ;;  %v362_v11 = vld [vmem:[%s3725_s22 + $0x20] sm:$0xff]   ;;  %v364_v14 = vld [vmem:[%s3725_s22 + $0x28] sm:$0xff]   ;;  %s3631_s15 = smov 280   ;;  %s3632_s16 = smov 304  }
  0x12   : > { %3124 = vmatpush3.bf16.msra.mxu1 %v3422_v3  ;;  %v366_v15 = vld [vmem:[%s3725_s22 + $0x30] sm:$0xff]   ;;  %v368_v18 = vld [vmem:[%s3725_s22 + $0x38] sm:$0xff]   ;;  %v2968_v20 = vld [vmem:[%s3780_s24 + $0x8] sm:$0xff]   ;;  %s3633_s17 = smov 264   ;;  %s3634_s18 = smov 288  }
  0x13   : > { %v2937_v21 = vld [vmem:[%s3780_s24] sm:$0xff]   ;;  %v2942_v22 = vunpack.c.l.bf16 %v2968_v20  ;;  %v2943_v29 = vunpack.c.h.bf16 %v2968_v20  ;;  %v2970_v30 = vld [vmem:[%s3780_s24 + $0x18] sm:$0xff]   ;;  %v2969_v39 = vld [vmem:[%s3780_s24 + $0x10] sm:$0xff]   ;;  %s3635_s20 = smov 312   ;;  %s3636_s21 = smov 336  }
  0x14   : > { %3106 = vmatmul.mubr.msk.bf16.vlgmr.msra.gmra.mxu0 %vm5013_vm0, %v356_v6  ;;  %v2938_v23 = vunpack.c.l.bf16 %v2937_v21  ;;  %v2939_v34 = vunpack.c.h.bf16 %v2937_v21  ;;  %v3803_v36 = vld [vmem:[%s5010_s7] ss:$0 sm:$0xff]  ;;  %v2950_v38 = vunpack.c.l.bf16 %v2970_v30  ;;  %v2946_v48 = vunpack.c.l.bf16 %v2969_v39  ;;  %v2972_v0 = vld [vmem:[%s3780_s24 + $0x28] sm:$0xff]   ;;  %s3637_s23 = smov 296   ;;  %s3639_s25 = smov 344  }
  0x15   : > { %3126 = vmatmul.mubr.msk.bf16.vlgmr.msra.gmra.mxu1 %vm5013_vm0, %v3426_v7  ;;  %3109 = vmatprep.mubr.msk.bf16.mxu0 %vm5013_vm0, %v358_v8  ;;  %v2951_v53 = vunpack.c.h.bf16 %v2970_v30  ;;  %v2947_v58 = vunpack.c.h.bf16 %v2969_v39  ;;  %v2971_v5 = vld [vmem:[%s3780_s24 + $0x20] sm:$0xff]   ;;  %s3640_s26 = smov 368   ;;  %s3641_s19 = smov 328  }
  0x16   : > { %3129 = vmatprep.mubr.msk.bf16.mxu1 %vm5013_vm0, %v3428_v9  ;;  %s3642_s27 = smov 352  }
  0x1c   : > { %3110 = vmatmul.mubr.msk.bf16.gmra.mxu0 %vm5013_vm0, %v360_v10 }
  0x1d   : > { %3130 = vmatmul.mubr.msk.bf16.gmra.mxu1 %vm5013_vm0, %v3430_v12  ;;  %3113 = vmatprep.mubr.msk.bf16.mxu0 %vm5013_vm0, %v362_v11 }
  0x1e   : > { %3133 = vmatprep.mubr.msk.bf16.mxu1 %vm5013_vm0, %v3432_v13  ;;  %v2958_v13 = vunpack.c.l.bf16 %v2972_v0 }
  0x24   : > { %3114 = vmatmul.mubr.msk.bf16.gmra.mxu0 %vm5013_vm0, %v364_v14 }
  0x25   : > { %3134 = vmatmul.mubr.msk.bf16.gmra.mxu1 %vm5013_vm0, %v3434_v16  ;;  %3117 = vmatprep.mubr.msk.bf16.mxu0 %vm5013_vm0, %v366_v15 }
  0x26   : > { %3137 = vmatprep.mubr.msk.bf16.mxu1 %vm5013_vm0, %v3436_v17 }
  0x2c   : > { %3118 = vmatmul.mubr.msk.bf16.gmra.mxu0 %vm5013_vm0, %v368_v18  ;;  %v2954_v18 = vunpack.c.l.bf16 %v2971_v5 }
  0x2d   : > { %3138 = vmatmul.mubr.msk.bf16.gmra.mxu1 %vm5013_vm0, %v3438_v19  ;;  %v3863_v19 = vld [vmem:[%s3780_s24 + $0x38] sm:$0xff]  }
  0xd4   : > { %v3107_v24 = vpop.f32.mrf.mxu0 }
  0xd5   : > { %v3789_v26 = vadd.f32 %v3107_v24, %v2942_v22  ;;  %v3791_v27 = vpop.f32.mrf.mxu1  ;;  %v2959_v22 = vunpack.c.h.bf16 %v2972_v0 }
  0xd6   : > { %v517_v28 = vpop.f32.mrf.mxu0 }
  0xd7   : > { %v798_v31 = vadd.f32 %v3787_v25, %v3789_v26  ;;  %v3796_v32 = vadd.f32 %v2938_v23, %v517_v28  ;;  %v3798_v33 = vpop.f32.mrf.mxu1  ;;  %v2955_v23 = vunpack.c.h.bf16 %v2971_v5 }
  0xd8   : > { %v3108_v35 = vpop.f32.mrf.mxu0 }
  0xd9   : > { %v3805_v37 = vpop.f32.mrf.mxu1  ;;  %v843_v40 = vadd.f32 %v3803_v36, %v3796_v32  ;;  %v3810_v41 = vadd.f32 %v3108_v35, %v2943_v29  ;;  %v796_v45 = vadd.f32 %v3787_v25, %v3796_v32  ;;  %v814_v54 = vmul.f32 0.25, %v798_v31 }
  0xda   : > { %v520_v42 = vpop.f32.mrf.mxu0 }
  0xdb   : > { %v3812_v43 = vadd.f32 %v2939_v34, %v520_v42  ;;  %v3814_v44 = vpop.f32.mrf.mxu1  ;;  %v799_v46 = vadd.f32 %v3787_v25, %v3810_v41  ;;  %v859_v55 = vmul.f32 0.25, %v843_v40  ;;  %v812_v1 = vmul.f32 0.25, %v796_v45 }
  0xdc   : > { %v3111_v47 = vpop.f32.mrf.mxu0  ;;  %v2966_v40 = vunpack.c.l.bf16 %v3863_v19 }
  0xdd   : > { %v797_v49 = vadd.f32 %v3787_v25, %v3812_v43  ;;  %v844_v50 = vadd.f32 %v3803_v36, %v3812_v43  ;;  %v3824_v51 = vadd.f32 %v3111_v47, %v2950_v38  ;;  %v3826_v52 = vpop.f32.mrf.mxu1  ;;  %v815_v56 = vmul.f32 0.25, %v799_v46 }
  0xde   : > { %v533_v57 = vpop.f32.mrf.mxu0 }
  0xdf   : > { %v813_v59 = vmul.f32 0.25, %v797_v49  ;;  %v860_v60 = vmul.f32 0.25, %v844_v50  ;;  %v802_v61 = vadd.f32 %v3787_v25, %v3824_v51  ;;  %v849_v62 = vadd.f32 %v3803_v36, %v3824_v51  ;;  %v3832_v63 = vpop.f32.mrf.mxu1 }
  0xe0   : > { %v3835_v2 = vpack.c.bf16 %v815_v56, %v814_v54  ;;  %v3837_v3 = vadd.f32 %v2946_v48, %v533_v57  ;;  %v3112_v4 = vpop.f32.mrf.mxu0  ;;  %v2973_v56 = vld [vmem:[%s3780_s24 + $0x30] sm:$0xff]   ;;  %s3638_s24 = smov 320  }
  0xe1   : > { %v3840_v6 = vadd.f32 %v3112_v4, %v2951_v53  ;;  %v3842_v7 = vpop.f32.mrf.mxu1  ;;  %v3844_v8 = vpack.c.bf16 %v860_v60, %v859_v55  ;;  %v3850_v12 = vpack.c.bf16 %v813_v59, %v812_v1  ;;  %v818_v20 = vmul.f32 0.25, %v802_v61 }
  0xe2   : > { %v800_v9 = vadd.f32 %v3787_v25, %v3837_v3  ;;  %v847_v10 = vadd.f32 %v3803_v36, %v3837_v3  ;;  %v536_v11 = vpop.f32.mrf.mxu0  ;;  %v865_v24 = vmul.f32 0.25, %v849_v62 }
  0xe3   : > { %v803_v14 = vadd.f32 %v3787_v25, %v3840_v6  ;;  %v850_v15 = vadd.f32 %v3803_v36, %v3840_v6  ;;  %v3856_v16 = vadd.f32 %v2947_v58, %v536_v11  ;;  %v3858_v17 = vpop.f32.mrf.mxu1  ;;  %3157 = vmatprep.mubr.msk.bf16.mxu0 %vm918_vm1, %v3844_v8  ;;  %3189 = vmatprep.mubr.msk.bf16.mxu1 %vm918_vm1, %v3850_v12 }
  0xe4   : > { %v3115_v21 = vpop.f32.mrf.mxu0  ;;  %v816_v34 = vmul.f32 0.25, %v800_v9  ;;  %v863_v49 = vmul.f32 0.25, %v847_v10  ;;  %v2962_v9 = vunpack.c.l.bf16 %v2973_v56  ;;  %v2967_v10 = vunpack.c.h.bf16 %v3863_v19 }
  0xe5   : > { %v819_v28 = vmul.f32 0.25, %v803_v14  ;;  %v866_v29 = vmul.f32 0.25, %v850_v15  ;;  %v801_v30 = vadd.f32 %v3787_v25, %v3856_v16  ;;  %v3869_v31 = vpop.f32.mrf.mxu1  ;;  %v848_v35 = vadd.f32 %v3803_v36, %v3856_v16 }
  0xe6   : > { %v558_v38 = vadd.f32 %v3115_v21, %v2958_v13  ;;  %v549_v39 = vpop.f32.mrf.mxu0 }
  0xe7   : > { %v817_v42 = vmul.f32 0.25, %v801_v30  ;;  %v550_v45 = vadd.f32 %v2954_v18, %v549_v39  ;;  %v3874_v46 = vpop.f32.mrf.mxu1  ;;  %v3876_v47 = vpack.c.bf16 %v866_v29, %v865_v24  ;;  %v3878_v48 = vpack.c.bf16 %v819_v28, %v818_v20 }
  0xe8   : > { %v864_v50 = vmul.f32 0.25, %v848_v35  ;;  %v806_v53 = vadd.f32 %v3787_v25, %v558_v38  ;;  %v853_v54 = vadd.f32 %v3803_v36, %v558_v38  ;;  %v3116_v55 = vpop.f32.mrf.mxu0  ;;  %v2963_v18 = vunpack.c.h.bf16 %v2973_v56 }
  0xe9   : > { %v804_v57 = vadd.f32 %v3787_v25, %v550_v45  ;;  %v851_v58 = vadd.f32 %v3803_v36, %v550_v45  ;;  %v561_v59 = vadd.f32 %v3116_v55, %v2959_v22  ;;  %v3885_v60 = vpop.f32.mrf.mxu1  ;;  %v3887_v61 = vpack.c.bf16 %v817_v42, %v816_v34 }
  0xea   : > { %v552_v62 = vpop.f32.mrf.mxu0  ;;  %v3889_v0 = vpack.c.bf16 %v864_v50, %v863_v49  ;;  %v822_v11 = vmul.f32 0.25, %v806_v53  ;;  %v869_v20 = vmul.f32 0.25, %v853_v54 }
  0xeb   : > { %v3891_v1 = vpack.c.bf16 %v561_v59, %v558_v38  ;;  %v807_v4 = vadd.f32 %v3787_v25, %v561_v59  ;;  %v3894_v5 = vpop.f32.mrf.mxu1  ;;  %v854_v13 = vadd.f32 %v3803_v36, %v561_v59  ;;  %v553_v14 = vadd.f32 %v2955_v23, %v552_v62 }
  0xec   : > { %v3119_v15 = vpop.f32.mrf.mxu0  ;;  %v820_v21 = vmul.f32 0.25, %v804_v57  ;;  %v867_v29 = vmul.f32 0.25, %v851_v58 }
  0xed   : > { %5023 = vst [vmem:[#allocation2_spill] sm:$0xff] %v3891_v1  ;;  %v823_v22 = vmul.f32 0.25, %v807_v4  ;;  %v574_v24 = vadd.f32 %v3119_v15, %v2966_v40  ;;  %v3139_v28 = vpop.f32.mrf.mxu1  ;;  %1145 = vrot.lane.b32.xlu1 %v3891_v1, %s3625_s28  ;;  %v870_v30 = vmul.f32 0.25, %v854_v13  ;;  %v805_v34 = vadd.f32 %v3787_v25, %v553_v14 }
  0xee   : > { %v852_v19 = vadd.f32 %v3803_v36, %v553_v14  ;;  %v565_v35 = vpop.f32.mrf.mxu0  ;;  %v3902_v38 = vpack.c.bf16 %v553_v14, %v550_v45  ;;  %v3920_v13 = vpack.c.bf16 %v3856_v16, %v3837_v3 }
  0xef   : > { %v810_v23 = vadd.f32 %v3787_v25, %v574_v24  ;;  %v857_v39 = vadd.f32 %v3803_v36, %v574_v24  ;;  %v566_v42 = vadd.f32 %v2962_v9, %v565_v35  ;;  %v758_v40 = vpop.f32.mrf.mxu1  ;;  %v821_v49 = vmul.f32 0.25, %v805_v34 }
  0xf0   : > { %5024 = vst [vmem:[#allocation3_spill] sm:$0xff] %v3902_v38  ;;  %v868_v50 = vmul.f32 0.25, %v852_v19  ;;  %v3120_v53 = vpop.f32.mrf.mxu0  ;;  %v3906_v54 = vpack.c.bf16 %v870_v30, %v869_v20  ;;  %v3908_v55 = vpack.c.bf16 %v823_v22, %v822_v11  ;;  %5025 = vst [vmem:[#allocation4_spill] sm:$0xff] %v3920_v13 }
  0xf1   : > { %v808_v56 = vadd.f32 %v3787_v25, %v566_v42  ;;  %v855_v57 = vadd.f32 %v3803_v36, %v566_v42  ;;  %v3140_v58 = vpop.f32.mrf.mxu1  ;;  %1143 = vrot.lane.b32.xlu1 %v3902_v38, %s3625_s28  ;;  %v577_v45 = vadd.f32 %v3120_v53, %v2967_v10  ;;  %v3916_v9 = vpack.c.bf16 %v821_v49, %v820_v21 }
  0xf2   : > { %v780_v59 = vpack.c.bf16 %v3140_v58, %v3139_v28  ;;  %v568_v62 = vpop.f32.mrf.mxu0  ;;  %v3914_v4 = vpack.c.bf16 %v868_v50, %v867_v29  ;;  %v3929_v10 = vpack.c.bf16 %v3812_v43, %v3796_v32  ;;  %v3955_v49 = vpack.c.bf16 %v3840_v6, %v3824_v51 }
  0xf3   : > { %v569_v11 = vadd.f32 %v2963_v18, %v568_v62  ;;  %v761_v14 = vpop.f32.mrf.mxu1  ;;  %v3922_v15 = vpack.c.bf16 %v577_v45, %v574_v24  ;;  %v811_v20 = vadd.f32 %v3787_v25, %v577_v45  ;;  %v858_v22 = vadd.f32 %v3803_v36, %v577_v45 }
  0xf4   : > { %v779_v30 = vpack.c.bf16 %v761_v14, %v758_v40  ;;  %3357 = vmatprep.subr.msk.bf16.mxu0 %vm918_vm1, %v780_v59  ;;  %v965_v16 = vsel %vm918_vm1, %v780_v59, 0  ;;  %v826_v18 = vmul.f32 0.25, %v810_v23  ;;  %v873_v24 = vmul.f32 0.25, %v857_v39  ;;  %5027 = vst [vmem:[#allocation6_spill] sm:$0xff] %v3955_v49 }
  0xf5   : > { %v809_v21 = vadd.f32 %v3787_v25, %v569_v11  ;;  %v856_v3 = vadd.f32 %v3803_v36, %v569_v11  ;;  %1139 = vrot.lane.b32.xlu1 %v3920_v13, %s3625_s28  ;;  %v827_v28 = vmul.f32 0.25, %v811_v20  ;;  %v874_v29 = vmul.f32 0.25, %v858_v22  ;;  %3142 = vmatpush3.bf16.xpose.msra.mxu0 %v965_v16 }
  0xf6   : > { %1149 = vrot.lane.b32.xlu0 %v3922_v15, %s3625_s28  ;;  %v824_v34 = vmul.f32 0.25, %v808_v56  ;;  %v871_v32 = vmul.f32 0.25, %v855_v57  ;;  %3358 = vmatprep.subr.msk.bf16.mxu0 %vm918_vm1, %v779_v30  ;;  %v3939_v25 = vpack.c.bf16 %v569_v11, %v566_v42  ;;  %v778_v42 = vpack.c.bf16 %v3885_v60, %v3869_v31 }
  0xf7   : > { %v825_v43 = vmul.f32 0.25, %v809_v21  ;;  %v872_v19 = vmul.f32 0.25, %v856_v3  ;;  %v3941_v35 = vpack.c.bf16 %v874_v29, %v873_v24  ;;  %v3943_v40 = vpack.c.bf16 %v827_v28, %v826_v18 }
  0xf8   : > { %5026 = vst [vmem:[#allocation5_spill] sm:$0xff] %v3939_v25  ;;  %v962_v50 = vsel %vm918_vm1, %v779_v30, 0  ;;  %v3966_v53 = vpack.c.bf16 %v3810_v41, %v3789_v26  ;;  %v777_v51 = vpack.c.bf16 %v3894_v5, %v3874_v46  ;;  %v959_v6 = vsel %vm918_vm1, %v778_v42, 0 }
  0xf9   : > { %1135 = vrot.lane.b32.xlu1 %v3929_v10, %s3625_s28  ;;  %v3947_v23 = vpack.c.bf16 %v872_v19, %v871_v32  ;;  %v3949_v39 = vpack.c.bf16 %v825_v43, %v824_v34  ;;  %v776_v31 = vpack.c.bf16 %v3842_v7, %v3826_v52  ;;  %v775_v52 = vpack.c.bf16 %v3858_v17, %v3832_v63 }
  0xfa   : > { %1147 = vrot.lane.b32.xlu0 %v3939_v25, %s3625_s28  ;;  %v956_v46 = vsel %vm918_vm1, %v777_v51, 0  ;;  %v774_v7 = vpack.c.bf16 %v3805_v37, %v3791_v27  ;;  %v846_v63 = vadd.f32 %v3803_v36, %v3810_v41  ;;  %v845_v17 = vadd.f32 %v3803_v36, %v3789_v26 }
  0xfb   : > { %v953_v60 = vsel %vm918_vm1, %v776_v31, 0  ;;  %v773_v27 = vpack.c.bf16 %v3814_v44, %v3798_v33  ;;  %v950_v5 = vsel %vm918_vm1, %v775_v52, 0 }
  0xfc   : > { %v862_v37 = vmul.f32 0.25, %v846_v63  ;;  %v861_v56 = vmul.f32 0.25, %v845_v17  ;;  %v947_v33 = vsel %vm918_vm1, %v774_v7, 0 }
  0xfd   : > { %1639 = vrot.lane.b32.xlu1 %v780_v59, %s3626_s29  ;;  %3144 = vmatpush3.bf16.xpose.msra.mxu0 %v962_v50  ;;  %v944_v36 = vsel %vm918_vm1, %v773_v27, 0 }
  0xfe   : > { %1141 = vrot.lane.b32.xlu0 %v3955_v49, %s3625_s28  ;;  %3359 = vmatprep.subr.msk.bf16.mxu0 %vm918_vm1, %v778_v42  ;;  %v876_v26 = vpack.c.bf16 %v862_v37, %v861_v56 }
 0x101   : > { %1635 = vrot.lane.b32.xlu1 %v778_v42, %s3626_s29 }
 0x102   : > { %1137 = vrot.lane.b32.xlu0 %v3966_v53, %s3625_s28  ;;  %s3643_s28 = smov 376  }
 0x105   : > { %1633 = vrot.lane.b32.xlu1 %v777_v51, %s3626_s29  ;;  %3146 = vmatpush3.bf16.xpose.msra.mxu0 %v959_v6 }
 0x106   : > { %1637 = vrot.lane.b32.xlu0 %v779_v30, %s3626_s29  ;;  %3360 = vmatprep.subr.msk.bf16.mxu0 %vm918_vm1, %v777_v51 }
 0x109   : > { %1631 = vrot.lane.b32.xlu1 %v776_v31, %s3626_s29 }
 0x10a   : > { %1478 = vrot.lane.b32.xlu0 %v3922_v15, %s3627_s11 }
 0x10d   : > { %1474 = vrot.lane.b32.xlu1 %v3891_v1, %s3627_s11  ;;  %3148 = vmatpush3.bf16.xpose.msra.mxu0 %v956_v46 }
 0x10e   : > { %1472 = vrot.lane.b32.xlu0 %v3902_v38, %s3627_s11  ;;  %3361 = vmatprep.subr.msk.bf16.mxu0 %vm918_vm1, %v776_v31 }
 0x111   : > { %1629 = vrot.lane.b32.xlu1 %v775_v52, %s3626_s29 }
 0x112   : > { %1470 = vrot.lane.b32.xlu0 %v3955_v49, %s3627_s11 }
 0x115   : > { %1468 = vrot.lane.b32.xlu1 %v3920_v13, %s3627_s11  ;;  %3150 = vmatpush3.bf16.xpose.msra.mxu0 %v953_v60 }
 0x116   : > { %1627 = vrot.lane.b32.xlu0 %v774_v7, %s3626_s29  ;;  %3362 = vmatprep.subr.msk.bf16.mxu0 %vm918_vm1, %v775_v52 }
 0x119   : > { %1466 = vrot.lane.b32.xlu1 %v3966_v53, %s3627_s11 }
 0x11a   : > { %1464 = vrot.lane.b32.xlu0 %v3929_v10, %s3627_s11 }
 0x11d   : > { %1625 = vrot.lane.b32.xlu1 %v773_v27, %s3626_s29  ;;  %3152 = vmatpush3.bf16.xpose.msra.mxu0 %v950_v5 }
 0x11e   : > { %1887 = vrot.lane.b32.xlu0 %v3922_v15, %s3628_s12  ;;  %3363 = vmatprep.subr.msk.bf16.mxu0 %vm918_vm1, %v774_v7 }
 0x121   : > { %1601 = vrot.lane.b32.xlu1 %v3844_v8, %s3626_s29 }
 0x122   : > { %1603 = vrot.lane.b32.xlu0 %v876_v26, %s3626_s29 }
 0x125   : > { %1605 = vrot.lane.b32.xlu1 %v3889_v0, %s3626_s29  ;;  %3154 = vmatpush3.bf16.xpose.msra.mxu0 %v947_v33 }
 0x126   : > { %1607 = vrot.lane.b32.xlu0 %v3876_v47, %s3626_s29  ;;  %3364 = vmatprep.subr.msk.bf16.mxu0 %vm918_vm1, %v773_v27 }
 0x129   : > { %1883 = vrot.lane.b32.xlu1 %v3891_v1, %s3628_s12 }
 0x12a   : > { %1476 = vrot.lane.b32.xlu0 %v3939_v25, %s3627_s11  ;;  %s3644_s11 = smov 360  }
 0x12d   : > { %1885 = vrot.lane.b32.xlu1 %v3939_v25, %s3628_s12  ;;  %3156 = vmatpush3.bf16.xpose.msra.mxu0 %v944_v36 }
 0x134   : > { %3158 = vmatmul.mubr.msk.bf16.vlgmr.msra.gmra.mxu0 %vm918_vm1, %v876_v26 }
 0x135   : > { %3161 = vmatprep.mubr.msk.bf16.mxu0 %vm918_vm1, %v3889_v0 }
 0x13c   : > { %3162 = vmatmul.mubr.msk.bf16.gmra.mxu0 %vm918_vm1, %v3876_v47 }
 0x13d   : > { %3165 = vmatprep.mubr.msk.bf16.mxu0 %vm918_vm1, %v3914_v4 }
 0x144   : > { %3166 = vmatmul.mubr.msk.bf16.gmra.mxu0 %vm918_vm1, %v3906_v54 }
 0x145   : > { %3169 = vmatprep.mubr.msk.bf16.mxu0 %vm918_vm1, %v3947_v23 }
 0x14c   : > { %3170 = vmatmul.mubr.msk.bf16.gmra.mxu0 %vm918_vm1, %v3941_v35 }
 0x15f   : > { %v1146_v8 = vpop.permute.xlu1 %1145 }
 0x160   : > { %v1191_v11 = vsel %vm918_vm1, %v1146_v8, 0 }
 0x163   : > { %v1144_v58 = vpop.permute.xlu1 %1143 }
 0x164   : > { %v1188_v30 = vsel %vm918_vm1, %v1144_v58, 0 }
 0x167   : > { %v1140_v59 = vpop.permute.xlu1 %1139 }
 0x168   : > { %v1150_v41 = vpop.permute.xlu0 %1149  ;;  %v1182_v32 = vsel %vm918_vm1, %v1140_v59, 0 }
 0x169   : > { %3365 = vmatprep.subr.msk.bf16.mxu1 %vm918_vm1, %v1150_v41  ;;  %v1197_v44 = vsel %vm918_vm1, %v1150_v41, 0 }
 0x16a   : > { %3174 = vmatpush3.bf16.xpose.msra.mxu1 %v1197_v44  ;;  %v883_v44 = vlaneseq }
 0x16b   : > { %v1136_v20 = vpop.permute.xlu1 %1135 }
 0x16c   : > { %v1148_v47 = vpop.permute.xlu0 %1147  ;;  %v1176_v31 = vsel %vm918_vm1, %v1136_v20, 0 }
 0x16d   : > { %3366 = vmatprep.subr.msk.bf16.mxu1 %vm918_vm1, %v1148_v47  ;;  %v1194_v57 = vsel %vm918_vm1, %v1148_v47, 0 }
 0x16f   : > { %v1640_v21 = vpop.permute.xlu1 %1639 }
 0x170   : > { %v1142_v0 = vpop.permute.xlu0 %1141  ;;  %v1687_v7 = vsel %vm918_vm1, %v1640_v21, 0 }
 0x171   : > { %v1185_v18 = vsel %vm918_vm1, %v1142_v0, 0 }
 0x172   : > { %3176 = vmatpush3.bf16.xpose.msra.mxu1 %v1194_v57 }
 0x173   : > { %3367 = vmatprep.subr.msk.bf16.mxu1 %vm918_vm1, %v1146_v8  ;;  %v1636_v24 = vpop.permute.xlu1 %1635 }
 0x174   : > { %v1138_v45 = vpop.permute.xlu0 %1137  ;;  %v1681_v17 = vsel %vm918_vm1, %v1636_v24, 0 }
 0x175   : > { %v1179_v50 = vsel %vm918_vm1, %v1138_v45, 0 }
 0x177   : > { %v1634_v29 = vpop.permute.xlu1 %1633 }
 0x178   : > { %v1638_v62 = vpop.permute.xlu0 %1637  ;;  %v1678_v5 = vsel %vm918_vm1, %v1634_v29, 0 }
 0x179   : > { %v1684_v63 = vsel %vm918_vm1, %v1638_v62, 0 }
 0x17a   : > { %3178 = vmatpush3.bf16.xpose.msra.mxu1 %v1191_v11 }
 0x17b   : > { %3368 = vmatprep.subr.msk.bf16.mxu1 %vm918_vm1, %v1144_v58  ;;  %v1632_v19 = vpop.permute.xlu1 %1631  ;;  %v4111_v58 = vand.u32 127, %v883_v44 }
 0x17c   : > { %v1479_v14 = vpop.permute.xlu0 %1478  ;;  %v1675_v56 = vsel %vm918_vm1, %v1632_v19, 0 }
 0x17d   : > { %3205 = vmatprep.subr.bf16.mxu0 %v1479_v14 }
 0x17e   : > { %3206 = vmatpush3.bf16.msra.mxu0 %v1479_v14 }
 0x17f   : > { %v1475_v51 = vpop.permute.xlu1 %1474 }
 0x180   : > { %v1473_v22 = vpop.permute.xlu0 %1472 }
 0x182   : > { %3180 = vmatpush3.bf16.xpose.msra.mxu1 %v1188_v30 }
 0x183   : > { %3369 = vmatprep.subr.msk.bf16.mxu1 %vm918_vm1, %v1142_v0  ;;  %v1630_v46 = vpop.permute.xlu1 %1629  ;;  %v4109_v0 = vshrl.u32 %v883_v44, 7 }
 0x184   : > { %v1471_v3 = vpop.permute.xlu0 %1470  ;;  %v1672_v26 = vsel %vm918_vm1, %v1630_v46, 0 }
 0x185   : > { %v4123_v14 = vadd.s32 88, %v4109_v0  ;;  %vm902_vm8 = vcmp.le.s32.totalorder %v4111_v58, %v4109_v0 }
 0x187   : > { %v1469_v52 = vpop.permute.xlu1 %1468  ;;  %vm913_vm3 = vcmp.le.s32.totalorder %v4111_v58, %v4123_v14 }
 0x188   : > { %v4053_v16 = vpop.permute.xlu0 %1627 }
 0x189   : > { %v1669_v33 = vsel %vm918_vm1, %v4053_v16, 0 }
 0x18a   : > { %3182 = vmatpush3.bf16.xpose.msra.mxu1 %v1185_v18 }
 0x18b   : > { %3370 = vmatprep.subr.msk.bf16.mxu1 %vm918_vm1, %v1140_v59  ;;  %v1467_v60 = vpop.permute.xlu1 %1466 }
 0x18c   : > { %v1465_v28 = vpop.permute.xlu0 %1464 }
 0x18f   : > { %v1626_v27 = vpop.permute.xlu1 %1625 }
 0x190   : > { %v4057_v34 = vpop.permute.xlu0 %1887  ;;  %v1666_v36 = vsel %vm918_vm1, %v1626_v27, 0 }
 0x192   : > { %3184 = vmatpush3.bf16.xpose.msra.mxu1 %v1182_v32 }
 0x193   : > { %3371 = vmatprep.subr.msk.bf16.mxu1 %vm918_vm1, %v1138_v45  ;;  %v1602_v37 = vpop.permute.xlu1 %1601  ;;  %v4114_v45 = vadd.s32 40, %v4109_v0 }
 0x194   : > { %v4061_v43 = vpop.permute.xlu0 %1603 }
 0x195   : > { %vm907_vm2 = vcmp.le.s32.totalorder %v4111_v58, %v4114_v45 }
 0x197   : > { %v1606_v41 = vpop.permute.xlu1 %1605 }
 0x198   : > { %v4063_v42 = vpop.permute.xlu0 %1607 }
 0x19a   : > { %3186 = vmatpush3.bf16.xpose.msra.mxu1 %v1179_v50  ;;  %v4160_v50 = vadd.s32 16, %v4109_v0 }
 0x19b   : > { %3372 = vmatprep.subr.msk.bf16.mxu1 %vm918_vm1, %v1136_v20 }
 0x19c   : > { %v1477_v6 = vpop.permute.xlu0 %1476  ;;  %vm904_vm7 = vcmp.le.s32.totalorder %v4111_v58, %v4160_v50 }
 0x19d   : > { %3207 = vmatprep.subr.bf16.mxu0 %v1477_v6 }
 0x19e   : > { %3208 = vmatpush3.bf16.msra.mxu0 %v1477_v6 }
 0x19f   : > { %3209 = vmatprep.subr.bf16.mxu0 %v1475_v51 }
 0x1a2   : > { %3188 = vmatpush3.bf16.xpose.msra.mxu1 %v1176_v31  ;;  %3210 = vmatpush3.bf16.msra.mxu0 %v1475_v51 }
 0x1a3   : > { %3211 = vmatprep.subr.bf16.mxu0 %v1473_v22  ;;  %3373 = vmatprep.subr.msk.bf16.mxu1 %vm918_vm1, %v1640_v21 }
 0x1a6   : > { %3212 = vmatpush3.bf16.msra.mxu0 %v1473_v22  ;;  %v4128_v22 = vadd.s32 72, %v4109_v0 }
 0x1a7   : > { %3213 = vmatprep.subr.bf16.mxu0 %v1471_v3 }
 0x1a8   : > { %vm911_vm4 = vcmp.le.s32.totalorder %v4111_v58, %v4128_v22  ;;  %v5033_v22 = vld [vmem:[#allocation2_spill] sm:$0xff] }
 0x1a9   : > { %3190 = vmatmul.mubr.msk.bf16.vlgmr.msra.gmra.mxu1 %vm918_vm1, %v3835_v2 }
 0x1aa   : > { %3193 = vmatprep.mubr.msk.bf16.mxu1 %vm918_vm1, %v3887_v61  ;;  %3214 = vmatpush3.bf16.msra.mxu0 %v1471_v3 }
 0x1ab   : > { %3238 = vmatpush3.bf16.xpose.msra.mxu1 %v1687_v7  ;;  %3215 = vmatprep.subr.bf16.mxu0 %v1469_v52 }
 0x1ac   : > { %3374 = vmatprep.subr.msk.bf16.mxu1 %vm918_vm1, %v1638_v62 }
 0x1ae   : > { %3216 = vmatpush3.bf16.msra.mxu0 %v1469_v52 }
 0x1af   : > { %3217 = vmatprep.subr.bf16.mxu0 %v1467_v60 }
 0x1b1   : > { %3194 = vmatmul.mubr.msk.bf16.gmra.mxu1 %vm918_vm1, %v3878_v48 }
 0x1b2   : > { %3197 = vmatprep.mubr.msk.bf16.mxu1 %vm918_vm1, %v3916_v9  ;;  %3218 = vmatpush3.bf16.msra.mxu0 %v1467_v60 }
 0x1b3   : > { %3240 = vmatpush3.bf16.xpose.msra.mxu1 %v1684_v63  ;;  %3219 = vmatprep.subr.bf16.mxu0 %v1465_v28  ;;  %v4172_v63 = vadd.s32 8, %v4109_v0 }
 0x1b4   : > { %3375 = vmatprep.subr.msk.bf16.mxu1 %vm918_vm1, %v1636_v24  ;;  %v4142_v24 = vadd.s32 104, %v4109_v0 }
 0x1b5   : > { %vm903_vm9 = vcmp.le.s32.totalorder %v4111_v58, %v4172_v63 }
 0x1b6   : > { %3220 = vmatpush3.bf16.msra.mxu0 %v1465_v28  ;;  %5029 = vst [vmem:[#allocation8_spill] sm:$0xff] %v4142_v24  ;;  %vm915_vm6 = vcmp.le.s32.totalorder %v4111_v58, %v4142_v24 }
 0x1b7   : > { %3381 = vmatprep.subr.msk.bf16.mxu0 %vm918_vm1, %v4057_v34 }
 0x1b9   : > { %3198 = vmatmul.mubr.msk.bf16.gmra.mxu1 %vm918_vm1, %v3908_v55 }
 0x1ba   : > { %3201 = vmatprep.mubr.msk.bf16.mxu1 %vm918_vm1, %v3949_v39 }
 0x1bb   : > { %3242 = vmatpush3.bf16.xpose.msra.mxu1 %v1681_v17 }
 0x1bc   : > { %3376 = vmatprep.subr.msk.bf16.mxu1 %vm918_vm1, %v1634_v29 }
 0x1c1   : > { %3202 = vmatmul.mubr.msk.bf16.gmra.mxu1 %vm918_vm1, %v3943_v40 }
 0x1c2   : > { %3253 = vmatprep.mubr.msk.bf16.mxu1 %vm918_vm1, %v1602_v37  ;;  %v4178_v37 = vadd.s32 24, %v4109_v0 }
 0x1c3   : > { %3244 = vmatpush3.bf16.xpose.msra.mxu1 %v1678_v5 }
 0x1c4   : > { %3377 = vmatprep.subr.msk.bf16.mxu1 %vm918_vm1, %v1632_v19  ;;  %vm905_vm10 = vcmp.le.s32.totalorder %v4111_v58, %v4178_v37 }
 0x1cb   : > { %3246 = vmatpush3.bf16.xpose.msra.mxu1 %v1675_v56 }
 0x1cc   : > { %3378 = vmatprep.subr.msk.bf16.mxu1 %vm918_vm1, %v1630_v46 }
 0x1d3   : > { %3248 = vmatpush3.bf16.xpose.msra.mxu1 %v1672_v26 }
 0x1d4   : > { %3379 = vmatprep.subr.msk.bf16.mxu1 %vm918_vm1, %v4053_v16  ;;  %v4137_v16 = vadd.s32 120, %v4109_v0 }
 0x1d6   : > { %5028 = vst [vmem:[#allocation7_spill] sm:$0xff] %v4137_v16  ;;  %vm917_vm5 = vcmp.le.s32.totalorder %v4111_v58, %v4137_v16 }
 0x1db   : > { %3250 = vmatpush3.bf16.xpose.msra.mxu1 %v1669_v33 }
 0x1dc   : > { %3380 = vmatprep.subr.msk.bf16.mxu1 %vm918_vm1, %v1626_v27 }
 0x1e3   : > { %3252 = vmatpush3.bf16.xpose.msra.mxu1 %v1666_v36 }
 0x1ea   : > { %3254 = vmatmul.mubr.msk.bf16.vlgmr.msra.gmra.mxu1 %vm918_vm1, %v4061_v43 }
 0x1eb   : > { %3257 = vmatprep.mubr.msk.bf16.mxu1 %vm918_vm1, %v1606_v41  ;;  %v4188_v41 = vadd.s32 48, %v4109_v0 }
 0x1ed   : > { %vm908_vm11 = vcmp.le.s32.totalorder %v4111_v58, %v4188_v41 }
 0x1f2   : > { %3258 = vmatmul.mubr.msk.bf16.gmra.mxu1 %vm918_vm1, %v4063_v42  ;;  %v4157_v42 = vpop.permute.xlu1 %1883 }
 0x1f4   : > { %v3159_v8 = vpop.f32.mrf.mxu0 }
 0x1f5   : > { %1073 = vrot.lane.b32.xlu0 %v3159_v8, %s3629_s13 }
 0x1f6   : > { %v1001_v47 = vpop.f32.mrf.mxu0  ;;  %v4162_v51 = vpop.permute.xlu1 %1885 }
 0x1f8   : > { %v3160_v57 = vpop.f32.mrf.mxu0 }
 0x1f9   : > { %1065 = vrot.lane.b32.xlu0 %v1001_v47, %s3630_s14  ;;  %1077 = vrot.lane.b32.xlu1 %v3160_v57, %s3631_s15 }
 0x1fa   : > { %v1004_v59 = vpop.f32.mrf.mxu0 }
 0x1fc   : > { %v3163_v62 = vpop.f32.mrf.mxu0 }
 0x1fd   : > { %1089 = vrot.lane.b32.xlu0 %v3163_v62, %s3632_s16  ;;  %1069 = vrot.lane.b32.xlu1 %v1004_v59, %s3633_s17 }
 0x1fe   : > { %v1017_v11 = vpop.f32.mrf.mxu0 }
 0x200   : > { %v3164_v20 = vpop.f32.mrf.mxu0 }
 0x201   : > { %1081 = vrot.lane.b32.xlu0 %v1017_v11, %s3634_s18  ;;  %1093 = vrot.lane.b32.xlu1 %v3164_v20, %s3635_s20  ;;  %v4207_v20 = vadd.s32 32, %v4109_v0 }
 0x202   : > { %v1020_v30 = vpop.f32.mrf.mxu0 }
 0x203   : > { %vm906_vm12 = vcmp.le.s32.totalorder %v4111_v58, %v4207_v20 }
 0x204   : > { %v3167_v21 = vpop.f32.mrf.mxu0 }
 0x205   : > { %1105 = vrot.lane.b32.xlu0 %v3167_v21, %s3636_s21  ;;  %1085 = vrot.lane.b32.xlu1 %v1020_v30, %s3637_s23 }
 0x206   : > { %v1033_v3 = vpop.f32.mrf.mxu0 }
 0x208   : > { %v3168_v18 = vpop.f32.mrf.mxu0 }
 0x209   : > { %1097 = vrot.lane.b32.xlu0 %v1033_v3, %s3638_s24  ;;  %1109 = vrot.lane.b32.xlu1 %v3168_v18, %s3639_s25 }
 0x20a   : > { %v1036_v28 = vpop.f32.mrf.mxu0 }
 0x20c   : > { %v3171_v29 = vpop.f32.mrf.mxu0 }
 0x20d   : > { %1121 = vrot.lane.b32.xlu0 %v3171_v29, %s3640_s26  ;;  %1101 = vrot.lane.b32.xlu1 %v1036_v28, %s3641_s19  ;;  %v4219_v29 = vadd.s32 80, %v4109_v0 }
 0x20e   : > { %v1049_v32 = vpop.f32.mrf.mxu0 }
 0x20f   : > { %vm912_vm13 = vcmp.le.s32.totalorder %v4111_v58, %v4219_v29 }
 0x210   : > { %v3172_v43 = vpop.f32.mrf.mxu0 }
 0x211   : > { %1113 = vrot.lane.b32.xlu0 %v1049_v32, %s3642_s27  ;;  %1125 = vrot.lane.b32.xlu1 %v3172_v43, %s3643_s28 }
 0x212   : > { %v1052_v19 = vpop.f32.mrf.mxu0 }
 0x215   : > { %1117 = vrot.lane.b32.xlu1 %v1052_v19, %s3644_s11 }
 0x219   : > { %1611 = vrot.lane.b32.xlu1 %v3906_v54, %s3626_s29 }
 0x21d   : > { %1881 = vrot.lane.b32.xlu1 %v3902_v38, %s3628_s12 }
 0x267   : > { %v1074_v6 = vpop.permute.xlu0 %1073 }
 0x269   : > { %v3191_v31 = vpop.f32.mrf.mxu1 }
 0x26a   : > { %v1242_v46 = vadd.f32 %v3191_v31, %v1074_v6 }
 0x26b   : > { %v1233_v52 = vpop.f32.mrf.mxu1  ;;  %v1066_v7 = vpop.permute.xlu0 %1065 }
 0x26c   : > { %v1078_v60 = vpop.permute.xlu1 %1077  ;;  %v4169_v54 = vsel %vm904_vm7, %v1242_v46, -inf  ;;  %v1234_v17 = vadd.f32 %v1233_v52, %v1066_v7  ;;  %v4230_v46 = vadd.s32 64, %v4109_v0 }
 0x26d   : > { %1316 = vmax.xlane.f32.xlu0 %v4169_v54  ;;  %v3192_v27 = vpop.f32.mrf.mxu1 }
 0x26e   : > { %v1245_v56 = vadd.f32 %v3192_v27, %v1078_v60  ;;  %v4183_v36 = vsel %vm902_vm8, %v1234_v17, -inf  ;;  %vm910_vm14 = vcmp.le.s32.totalorder %v4111_v58, %v4230_v46 }
 0x26f   : > { %v1236_v5 = vpop.f32.mrf.mxu1  ;;  %v1090_v26 = vpop.permute.xlu0 %1089 }
 0x270   : > { %v1070_v33 = vpop.permute.xlu1 %1069  ;;  %v4202_v11 = vsel %vm905_vm10, %v1245_v56, -inf }
 0x271   : > { %v1237_v44 = vadd.f32 %v1236_v5, %v1070_v33  ;;  %v3195_v8 = vpop.f32.mrf.mxu1  ;;  %1312 = vmax.xlane.f32.xlu0 %v4183_v36  ;;  %v4241_v5 = vadd.s32 112, %v4109_v0 }
 0x272   : > { %v1258_v47 = vadd.f32 %v3195_v8, %v1090_v26 }
 0x273   : > { %v1249_v57 = vpop.f32.mrf.mxu1  ;;  %v4196_v59 = vsel %vm903_vm9, %v1237_v44, -inf  ;;  %v1082_v62 = vpop.permute.xlu0 %1081  ;;  %vm5014_vm15 = vcmp.le.s32.totalorder %v4111_v58, %v4241_v5 }
 0x274   : > { %1314 = vmax.xlane.f32.xlu1 %v4196_v59  ;;  %v1250_v21 = vadd.f32 %v1249_v57, %v1082_v62  ;;  %v4213_v18 = vsel %vm908_vm11, %v1258_v47, -inf  ;;  %v4252_v47 = vadd.s32 96, %v4109_v0 }
 0x275   : > { %v3196_v30 = vpop.f32.mrf.mxu1  ;;  %1318 = vmax.xlane.f32.xlu0 %v4202_v11 }
 0x276   : > { %v4224_v6 = vsel %vm906_vm12, %v1250_v21, -inf  ;;  %5030 = vst [vmem:[#allocation9_spill] sm:$0xff] %v4252_v47  ;;  %vm914_vm0 = vcmp.le.s32.totalorder %v4111_v58, %v4252_v47 }
 0x277   : > { %v1252_v3 = vpop.f32.mrf.mxu1  ;;  %v1106_v28 = vpop.permute.xlu0 %1105 }
 0x278   : > { %1324 = vmax.xlane.f32.xlu1 %v4213_v18 }
 0x279   : > { %v3199_v32 = vpop.f32.mrf.mxu1 }
 0x27a   : > { %v1274_v43 = vadd.f32 %v3199_v32, %v1106_v28  ;;  %v1094_v28 = vpop.permute.xlu1 %1093 }
 0x27b   : > { %v1265_v19 = vpop.f32.mrf.mxu1  ;;  %v1098_v31 = vpop.permute.xlu0 %1097 }
 0x27c   : > { %1320 = vmax.xlane.f32.xlu1 %v4224_v6  ;;  %v1266_v7 = vadd.f32 %v1265_v19, %v1098_v31  ;;  %v4235_v17 = vsel %vm912_vm13, %v1274_v43, -inf  ;;  %v4273_v43 = vadd.s32 56, %v4109_v0  ;;  %v1261_v31 = vadd.f32 %v3196_v30, %v1094_v28 }
 0x27d   : > { %v3200_v52 = vpop.f32.mrf.mxu1 }
 0x27e   : > { %v4246_v33 = vsel %vm910_vm14, %v1266_v7, -inf  ;;  %v1086_v32 = vpop.permute.xlu1 %1085 }
 0x27f   : > { %v1268_v60 = vpop.f32.mrf.mxu1  ;;  %v1122_v27 = vpop.permute.xlu0 %1121 }
 0x280   : > { %1332 = vmax.xlane.f32.xlu1 %v4235_v17 }
 0x281   : > { %v3203_v56 = vpop.f32.mrf.mxu1 }
 0x282   : > { %v1290_v26 = vadd.f32 %v3203_v56, %v1122_v27  ;;  %v1110_v19 = vpop.permute.xlu1 %1109 }
 0x283   : > { %v1114_v44 = vpop.permute.xlu0 %1113  ;;  %v1281_v8 = vpop.f32.mrf.mxu1  ;;  %v1277_v56 = vadd.f32 %v3200_v52, %v1110_v19 }
 0x284   : > { %1328 = vmax.xlane.f32.xlu1 %v4246_v33  ;;  %v1282_v57 = vadd.f32 %v1281_v8, %v1114_v44  ;;  %v4257_v62 = vsel %vm5014_vm15, %v1290_v26, -inf  ;;  %vm909_vm15 = vcmp.le.s32.totalorder %v4111_v58, %v4273_v43 }
 0x285   : > { %v4280_v7 = vsel %vm909_vm15, %v1261_v31, -inf  ;;  %v3204_v44 = vpop.f32.mrf.mxu1 }
 0x286   : > { %v4267_v21 = vsel %vm914_vm0, %v1282_v57, -inf  ;;  %v1102_v27 = vpop.permute.xlu1 %1101 }
 0x287   : > { %v1269_v26 = vadd.f32 %v1268_v60, %v1102_v27  ;;  %v1284_v57 = vpop.f32.mrf.mxu1 }
 0x288   : > { %1340 = vmax.xlane.f32.xlu1 %v4257_v62 }
 0x289   : > { %v4298_v52 = vsel %vm911_vm4, %v1269_v26, -inf }
 0x28a   : > { %v1126_v30 = vpop.permute.xlu1 %1125 }
 0x28b   : > { %1609 = vrot.lane.b32.xlu0 %v3914_v4, %s3626_s29  ;;  %v1253_v4 = vadd.f32 %v1252_v3, %v1086_v32  ;;  %v4292_v3 = vsel %vm913_vm3, %v1277_v56, -inf  ;;  %v1293_v8 = vadd.f32 %v3204_v44, %v1126_v30 }
 0x28c   : > { %1336 = vmax.xlane.f32.xlu1 %v4267_v21 }
 0x28d   : > { %v4304_v60 = vsel %vm917_vm5, %v1293_v8, -inf }
 0x28e   : > { %v1118_v28 = vpop.permute.xlu1 %1117 }
 0x28f   : > { %v1285_v32 = vadd.f32 %v1284_v57, %v1118_v28 }
 0x291   : > { %v4310_v19 = vsel %vm915_vm6, %v1285_v32, -inf }
 0x292   : > { %v1612_v31 = vpop.permute.xlu1 %1611 }
 0x296   : > { %v4314_v56 = vpop.permute.xlu1 %1881 }
 0x29d   : > { %1613 = vrot.lane.b32.xlu1 %v3947_v23, %s3626_s29  ;;  %v4286_v23 = vsel %vm907_vm2, %v1253_v4, -inf }
 0x2aa   : > { %1326 = vmax.xlane.f32.xlu0 %v4280_v7 }
 0x2ae   : > { %1322 = vmax.xlane.f32.xlu0 %v4286_v23 }
 0x2b2   : > { %1334 = vmax.xlane.f32.xlu0 %v4292_v3 }
 0x2b6   : > { %1330 = vmax.xlane.f32.xlu0 %v4298_v52 }
 0x2ba   : > { %1342 = vmax.xlane.f32.xlu0 %v4304_v60 }
 0x2be   : > { %1338 = vmax.xlane.f32.xlu0 %v4310_v19 }
 0x2f6   : > { %v1317_v4 = vpop.xlane.xlu0 %1316 }
 0x2f7   : > { %v1346_v27 = vsub.f32 %v4169_v54, %v1317_v4 }
 0x2f9   : > { %v1364_v30 = vmul.f32 1.442695, %v1346_v27 }
 0x2fa   : > { %v1313_v26 = vpop.xlane.xlu0 %1312 }
 0x2fb   : > { %3449 = vpow2.f32 %v1364_v30  ;;  %v1344_v44 = vsub.f32 %v4183_v36, %v1313_v26 }
 0x2fd   : > { %v1360_v8 = vmul.f32 1.442695, %v1344_v44  ;;  %v1315_v57 = vpop.xlane.xlu1 %1314 }
 0x2fe   : > { %v1345_v28 = vsub.f32 %v4196_v59, %v1315_v57  ;;  %v1319_v24 = vpop.xlane.xlu0 %1318 }
 0x2ff   : > { %3451 = vpow2.f32 %v1360_v8  ;;  %v1347_v32 = vsub.f32 %v4202_v11, %v1319_v24 }
 0x300   : > { %v1362_v16 = vmul.f32 1.442695, %v1345_v28 }
 0x301   : > { %v1366_v38 = vmul.f32 1.442695, %v1347_v32  ;;  %v1325_v25 = vpop.xlane.xlu1 %1324 }
 0x302   : > { %3453 = vpow2.f32 %v1362_v16  ;;  %v1610_v54 = vpop.permute.xlu0 %1609  ;;  %v1350_v26 = vsub.f32 %v4213_v18, %v1325_v25 }
 0x303   : > { %3455 = vpow2.f32 %v1366_v38  ;;  %3261 = vmatprep.mubr.msk.bf16.mxu1 %vm918_vm1, %v1610_v54 }
 0x304   : > { %3262 = vmatmul.mubr.msk.bf16.gmra.mxu1 %vm918_vm1, %v1612_v31  ;;  %v1372_v44 = vmul.f32 1.442695, %v1350_v26 }
 0x305   : > { %v1321_v4 = vpop.xlane.xlu1 %1320 }
 0x306   : > { %v1348_v8 = vsub.f32 %v4224_v6, %v1321_v4  ;;  %3457 = vpow2.f32 %v1372_v44 }
 0x308   : > { %v4321_v36 = vpop.eup %3449  ;;  %v1368_v28 = vmul.f32 1.442695, %v1348_v8 }
 0x309   : > { %v1333_v27 = vpop.xlane.xlu1 %1332  ;;  %1396 = vadd.xlane.f32.xlu0 %v4321_v36 }
 0x30a   : > { %3459 = vpow2.f32 %v1368_v28 }
 0x30c   : > { %v4324_v59 = vpop.eup %3451 }
 0x30d   : > { %v1329_v30 = vpop.xlane.xlu1 %1328  ;;  %1392 = vadd.xlane.f32.xlu1 %v4324_v59 }
 0x30f   : > { %v4327_v24 = vpop.eup %3453 }
 0x310   : > { %v4329_v16 = vpop.eup %3455  ;;  %1394 = vadd.xlane.f32.xlu0 %v4327_v24 }
 0x311   : > { %v1341_v38 = vpop.xlane.xlu1 %1340  ;;  %1398 = vadd.xlane.f32.xlu1 %v4329_v16 }
 0x315   : > { %v1337_v11 = vpop.xlane.xlu1 %1336 }
 0x319   : > { %v1614_v31 = vpop.permute.xlu1 %1613 }
 0x31a   : > { %3265 = vmatprep.mubr.msk.bf16.mxu1 %vm918_vm1, %v1614_v31  ;;  %v1352_v31 = vsub.f32 %v4246_v33, %v1329_v30  ;;  %v1358_v33 = vsub.f32 %v4257_v62, %v1341_v38  ;;  %v4349_v30 = vpop.eup %3457 }
 0x31c   : > { %v1376_v25 = vmul.f32 1.442695, %v1352_v31  ;;  %v3255_v31 = vpop.f32.mrf.mxu1 }
 0x322   : > { %1879 = vrot.lane.b32.xlu1 %v3955_v49, %s3628_s12 }
 0x326   : > { %1615 = vrot.lane.b32.xlu0 %v3941_v35, %s3626_s29  ;;  %1877 = vrot.lane.b32.xlu1 %v3920_v13, %s3628_s12  ;;  %v1354_v35 = vsub.f32 %v4235_v17, %v1333_v27  ;;  %v1356_v17 = vsub.f32 %v4267_v21, %v1337_v11 }
 0x328   : > { %v1380_v6 = vmul.f32 1.442695, %v1354_v35  ;;  %v1384_v27 = vmul.f32 1.442695, %v1356_v17  ;;  %v1723_v35 = vpop.f32.mrf.mxu1 }
 0x333   : > { %v1327_v57 = vpop.xlane.xlu0 %1326 }
 0x334   : > { %v1351_v32 = vsub.f32 %v4280_v7, %v1327_v57 }
 0x336   : > { %v1374_v13 = vmul.f32 1.442695, %v1351_v32 }
 0x337   : > { %v1323_v54 = vpop.xlane.xlu0 %1322 }
 0x338   : > { %v1349_v49 = vsub.f32 %v4286_v23, %v1323_v54 }
 0x33a   : > { %v1370_v1 = vmul.f32 1.442695, %v1349_v49 }
 0x33b   : > { %v1335_v47 = vpop.xlane.xlu0 %1334 }
 0x33c   : > { %3461 = vpow2.f32 %v1370_v1  ;;  %v1355_v18 = vsub.f32 %v4292_v3, %v1335_v47  ;;  %v1388_v1 = vmul.f32 1.442695, %v1358_v33  ;;  %v4353_v47 = vpop.eup %3459 }
 0x33d   : > { %3463 = vpow2.f32 %v1374_v13 }
 0x33e   : > { %3465 = vpow2.f32 %v1376_v25  ;;  %v1382_v7 = vmul.f32 1.442695, %v1355_v18  ;;  %v3256_v25 = vpop.f32.mrf.mxu1 }
 0x33f   : > { %v1331_v4 = vpop.xlane.xlu0 %1330  ;;  %3467 = vpow2.f32 %v1380_v6 }
 0x340   : > { %v1353_v26 = vsub.f32 %v4298_v52, %v1331_v4  ;;  %3469 = vpow2.f32 %v1382_v7  ;;  %v1726_v18 = vpop.f32.mrf.mxu1 }
 0x342   : > { %v1378_v49 = vmul.f32 1.442695, %v1353_v26  ;;  %v3259_v6 = vpop.f32.mrf.mxu1 }
 0x343   : > { %v1343_v23 = vpop.xlane.xlu0 %1342 }
 0x344   : > { %3471 = vpow2.f32 %v1378_v49  ;;  %v1359_v38 = vsub.f32 %v4304_v60, %v1343_v23  ;;  %v1739_v4 = vpop.f32.mrf.mxu1 }
 0x345   : > { %1404 = vadd.xlane.f32.xlu0 %v4349_v30  ;;  %3473 = vpow2.f32 %v1388_v1 }
 0x347   : > { %v1339_v13 = vpop.xlane.xlu0 %1338 }
 0x348   : > { %v1357_v3 = vsub.f32 %v4310_v19, %v1339_v13  ;;  %v1390_v19 = vmul.f32 1.442695, %v1359_v38 }
 0x349   : > { %v4356_v52 = vpop.eup %3461  ;;  %1400 = vadd.xlane.f32.xlu0 %v4353_v47 }
 0x34a   : > { %v1386_v62 = vmul.f32 1.442695, %v1357_v3  ;;  %1402 = vadd.xlane.f32.xlu1 %v4356_v52  ;;  %v4361_v44 = vpop.eup %3463 }
 0x34b   : > { %v4363_v21 = vpop.eup %3465 }
 0x34c   : > { %3475 = vpow2.f32 %v1386_v62  ;;  %v4367_v11 = vpop.eup %3467  ;;  %v1935_v62 = vsel %vm918_vm1, %v4057_v34, 0  ;;  %v1926_v34 = vsel %vm918_vm1, %v4314_v56, 0 }
 0x34d   : > { %1406 = vadd.xlane.f32.xlu0 %v4361_v44  ;;  %3477 = vpow2.f32 %v1384_v27  ;;  %v4369_v8 = vpop.eup %3469 }
 0x34e   : > { %1408 = vadd.xlane.f32.xlu1 %v4363_v21  ;;  %3479 = vpow2.f32 %v1390_v19 }
 0x351   : > { %1412 = vadd.xlane.f32.xlu0 %v4367_v11  ;;  %v4373_v60 = vpop.eup %3471 }
 0x352   : > { %1414 = vadd.xlane.f32.xlu1 %v4369_v8  ;;  %v4376_v57 = vpop.eup %3473 }
 0x355   : > { %1410 = vadd.xlane.f32.xlu0 %v4373_v60 }
 0x359   : > { %v4378_v28 = vpop.eup %3475  ;;  %1420 = vadd.xlane.f32.xlu0 %v4376_v57 }
 0x35a   : > { %1418 = vadd.xlane.f32.xlu1 %v4378_v28  ;;  %v4382_v32 = vpop.eup %3477 }
 0x35b   : > { %v4385_v54 = vpop.eup %3479 }
 0x35d   : > { %1416 = vadd.xlane.f32.xlu0 %v4382_v32 }
 0x361   : > { %1422 = vadd.xlane.f32.xlu0 %v4385_v54 }
 0x36b   : > { %1873 = vrot.lane.b32.xlu1 %v3929_v10, %s3628_s12 }
 0x36f   : > { %1859 = vrot.lane.b32.xlu1 %v3835_v2, %s3626_s29  ;;  %v3260_v2 = vpop.f32.mrf.mxu1 }
 0x373   : > { %1863 = vrot.lane.b32.xlu1 %v3878_v48, %s3626_s29  ;;  %v1742_v48 = vpop.f32.mrf.mxu1 }
 0x377   : > { %1875 = vrot.lane.b32.xlu0 %v3966_v53, %s3628_s12  ;;  %1867 = vrot.lane.b32.xlu1 %v3908_v55, %s3626_s29 }
 0x37b   : > { %1857 = vrot.lane.b32.xlu0 %v3850_v12, %s3626_s29  ;;  %1871 = vrot.lane.b32.xlu1 %v3943_v40, %s3626_s29 }
 0x37f   : > { %1861 = vrot.lane.b32.xlu0 %v3887_v61, %s3626_s29  ;;  %1791 = vrot.lane.b32.xlu1 %v1726_v18, %s3633_s17 }
 0x383   : > { %1865 = vrot.lane.b32.xlu0 %v3916_v9, %s3626_s29  ;;  %1799 = vrot.lane.b32.xlu1 %v3256_v25, %s3631_s15 }
 0x387   : > { %1869 = vrot.lane.b32.xlu0 %v3949_v39, %s3626_s29  ;;  %1807 = vrot.lane.b32.xlu1 %v1742_v48, %s3637_s23  ;;  %s3645_s29 = smov 48  }
 0x38b   : > { %1787 = vrot.lane.b32.xlu0 %v1723_v35, %s3630_s14  ;;  %1815 = vrot.lane.b32.xlu1 %v3260_v2, %s3635_s20 }
 0x38f   : > { %1795 = vrot.lane.b32.xlu0 %v3255_v31, %s3629_s13 }
 0x392   : > { %v1397_v12 = vpop.xlane.xlu0 %1396 }
 0x393   : > { %1803 = vrot.lane.b32.xlu0 %v1739_v4, %s3634_s18 }
 0x396   : > { %v1393_v61 = vpop.xlane.xlu1 %1392 }
 0x397   : > { %1811 = vrot.lane.b32.xlu0 %v3259_v6, %s3632_s16  ;;  %3481 = vrcp.f32 %v1393_v61  ;;  %s3646_s16 = smov 16  }
 0x398   : > { %3483 = vrcp.f32 %v1397_v12 }
 0x399   : > { %v1395_v55 = vpop.xlane.xlu0 %1394 }
 0x39a   : > { %3485 = vrcp.f32 %v1395_v55  ;;  %v1399_v9 = vpop.xlane.xlu1 %1398 }
 0x39b   : > { %3487 = vrcp.f32 %v1399_v9 }
 0x39d   : > { %v1616_v40 = vpop.permute.xlu0 %1615 }
 0x39e   : > { %3266 = vmatmul.mubr.msk.bf16.gmra.mxu1 %vm918_vm1, %v1616_v40 }
 0x3a4   : > { %v3482_v39 = vpop.eup %3481 }
 0x3a5   : > { %v3484_v7 = vpop.eup %3483  ;;  %v1440_v49 = vmul.f32 %v3482_v39, %v4324_v59  ;;  %v1932_v59 = vsel %vm918_vm1, %v4162_v51, 0 }
 0x3a6   : > { %v1442_v1 = vmul.f32 %v3484_v7, %v4321_v36  ;;  %v1929_v36 = vsel %vm918_vm1, %v4157_v42, 0 }
 0x3a7   : > { %v3486_v26 = vpop.eup %3485 }
 0x3a8   : > { %v3488_v33 = vpop.eup %3487  ;;  %v1441_v23 = vmul.f32 %v3486_v26, %v4327_v24 }
 0x3a9   : > { %v1443_v17 = vmul.f32 %v3488_v33, %v4329_v16  ;;  %v1880_v16 = vpop.permute.xlu1 %1879 }
 0x3aa   : > { %v1456_v13 = vpack.c.bf16 %v1441_v23, %v1440_v49 }
 0x3ab   : > { %v1457_v3 = vpack.c.bf16 %v1443_v17, %v1442_v1 }
 0x3ac   : > { %3221 = vmatprep.mubr.bf16.mxu0 %v1456_v13 }
 0x3ad   : > { %3222 = vmatmul.mubr.bf16.vlgmr.msra.gmra.mxu0 %v1457_v3  ;;  %v1878_v19 = vpop.permute.xlu1 %1877 }
 0x3ae   : > { %3270 = vmatpush3.bf16.xpose.msra.mxu0 %v1935_v62  ;;  %v1920_v25 = vsel %vm918_vm1, %v1878_v19, 0 }
 0x3af   : > { %3382 = vmatprep.subr.msk.bf16.mxu0 %vm918_vm1, %v4162_v51 }
 0x3b6   : > { %3272 = vmatpush3.bf16.xpose.msra.mxu0 %v1932_v59 }
 0x3b7   : > { %3383 = vmatprep.subr.msk.bf16.mxu0 %vm918_vm1, %v4157_v42  ;;  %v1923_v42 = vsel %vm918_vm1, %v1880_v16, 0 }
 0x3be   : > { %3274 = vmatpush3.bf16.xpose.msra.mxu0 %v1929_v36 }
 0x3bf   : > { %3384 = vmatprep.subr.msk.bf16.mxu0 %vm918_vm1, %v4314_v56 }
 0x3c4   : > { %v3263_v24 = vpop.f32.mrf.mxu1 }
 0x3c6   : > { %3276 = vmatpush3.bf16.xpose.msra.mxu0 %v1926_v34  ;;  %v1755_v27 = vpop.f32.mrf.mxu1 }
 0x3c7   : > { %3385 = vmatprep.subr.msk.bf16.mxu0 %vm918_vm1, %v1880_v16  ;;  %1819 = vrot.lane.b32.xlu0 %v1755_v27, %s3638_s24 }
 0x3c8   : > { %v3264_v51 = vpop.f32.mrf.mxu1 }
 0x3ca   : > { %v1758_v38 = vpop.f32.mrf.mxu1 }
 0x3cb   : > { %1823 = vrot.lane.b32.xlu1 %v1758_v38, %s3641_s19  ;;  %1827 = vrot.lane.b32.xlu0 %v3263_v24, %s3636_s21 }
 0x3ce   : > { %v1405_v31 = vpop.xlane.xlu0 %1404  ;;  %3278 = vmatpush3.bf16.xpose.msra.mxu0 %v1923_v42 }
 0x3cf   : > { %3386 = vmatprep.subr.msk.bf16.mxu0 %vm918_vm1, %v1878_v19  ;;  %1831 = vrot.lane.b32.xlu1 %v3264_v51, %s3639_s25 }
 0x3d2   : > { %v1401_v56 = vpop.xlane.xlu0 %1400 }
 0x3d3   : > { %3489 = vrcp.f32 %v1401_v56  ;;  %v1403_v35 = vpop.xlane.xlu1 %1402 }
 0x3d4   : > { %3491 = vrcp.f32 %v1403_v35 }
 0x3d5   : > { %3493 = vrcp.f32 %v1405_v31 }
 0x3d6   : > { %v1407_v18 = vpop.xlane.xlu0 %1406  ;;  %3280 = vmatpush3.bf16.xpose.msra.mxu0 %v1920_v25 }
 0x3d7   : > { %3495 = vrcp.f32 %v1407_v18  ;;  %v1409_v6 = vpop.xlane.xlu1 %1408 }
 0x3da   : > { %v1413_v4 = vpop.xlane.xlu0 %1412 }
 0x3db   : > { %v1415_v2 = vpop.xlane.xlu1 %1414 }
 0x3dc   : > { %3497 = vrcp.f32 %v1415_v2 }
 0x3dd   : > { %3499 = vrcp.f32 %v1409_v6 }
 0x3de   : > { %3501 = vrcp.f32 %v1413_v4  ;;  %v1411_v48 = vpop.xlane.xlu0 %1410 }
 0x3df   : > { %3503 = vrcp.f32 %v1411_v48 }
 0x3e0   : > { %v3490_v12 = vpop.eup %3489 }
 0x3e1   : > { %v3492_v61 = vpop.eup %3491  ;;  %v1444_v40 = vmul.f32 %v3490_v12, %v4353_v47 }
 0x3e2   : > { %v3494_v55 = vpop.eup %3493  ;;  %v1421_v9 = vpop.xlane.xlu0 %1420  ;;  %v1445_v39 = vmul.f32 %v3492_v61, %v4356_v52 }
 0x3e3   : > { %v1419_v7 = vpop.xlane.xlu1 %1418  ;;  %v1446_v49 = vmul.f32 %v3494_v55, %v4349_v30 }
 0x3e4   : > { %v3496_v26 = vpop.eup %3495  ;;  %v1458_v33 = vpack.c.bf16 %v1445_v39, %v1444_v40  ;;  %3505 = vrcp.f32 %v1419_v7 }
 0x3e5   : > { %v1447_v23 = vmul.f32 %v3496_v26, %v4361_v44 }
 0x3e6   : > { %v1417_v1 = vpop.xlane.xlu0 %1416  ;;  %3225 = vmatprep.mubr.bf16.mxu0 %v1458_v33 }
 0x3e7   : > { %3507 = vrcp.f32 %v1417_v1  ;;  %v1459_v17 = vpack.c.bf16 %v1447_v23, %v1446_v49  ;;  %v1874_v27 = vpop.permute.xlu1 %1873 }
 0x3e8   : > { %3509 = vrcp.f32 %v1421_v9 }
 0x3e9   : > { %v3498_v13 = vpop.eup %3497  ;;  %3226 = vmatmul.mubr.bf16.gmra.mxu0 %v1459_v17 }
 0x3ea   : > { %v3500_v3 = vpop.eup %3499  ;;  %v1423_v62 = vpop.xlane.xlu0 %1422  ;;  %v1451_v59 = vmul.f32 %v3498_v13, %v4369_v8 }
 0x3eb   : > { %v3502_v47 = vpop.eup %3501  ;;  %3511 = vrcp.f32 %v1423_v62  ;;  %v1448_v36 = vmul.f32 %v3500_v3, %v4363_v21  ;;  %v1860_v6 = vpop.permute.xlu1 %1859 }
 0x3ec   : > { %v3504_v52 = vpop.eup %3503  ;;  %v1450_v44 = vmul.f32 %v3502_v47, %v4367_v11  ;;  %v1914_v11 = vsel %vm918_vm1, %v1874_v27, 0 }
 0x3ed   : > { %v1449_v30 = vmul.f32 %v3504_v52, %v4373_v60 }
 0x3ee   : > { %v1876_v24 = vpop.permute.xlu0 %1875  ;;  %v1461_v51 = vpack.c.bf16 %v1451_v59, %v1450_v44 }
 0x3ef   : > { %3387 = vmatprep.subr.msk.bf16.mxu0 %vm918_vm1, %v1876_v24  ;;  %v1917_v34 = vsel %vm918_vm1, %v1876_v24, 0  ;;  %v1460_v16 = vpack.c.bf16 %v1449_v30, %v1448_v36 }
 0x3f0   : > { %3282 = vmatpush3.bf16.xpose.msra.mxu0 %v1917_v34 }
 0x3f1   : > { %3229 = vmatprep.mubr.bf16.mxu0 %v1460_v16  ;;  %3388 = vmatprep.subr.msk.bf16.mxu0 %vm918_vm1, %v1874_v27  ;;  %v3506_v38 = vpop.eup %3505 }
 0x3f2   : > { %3230 = vmatmul.mubr.bf16.gmra.mxu0 %v1461_v51  ;;  %v1453_v60 = vmul.f32 %v3506_v38, %v4378_v28  ;;  %v1858_v18 = vpop.permute.xlu0 %1857  ;;  %v1864_v28 = vpop.permute.xlu1 %1863 }
 0x3f4   : > { %v3508_v8 = vpop.eup %3507 }
 0x3f5   : > { %v1452_v21 = vmul.f32 %v3508_v8, %v4382_v32  ;;  %v3510_v42 = vpop.eup %3509 }
 0x3f6   : > { %v1454_v56 = vmul.f32 %v3510_v42, %v4376_v57  ;;  %v1862_v32 = vpop.permute.xlu0 %1861  ;;  %v1868_v57 = vpop.permute.xlu1 %1867 }
 0x3f7   : > { %v1462_v19 = vpack.c.bf16 %v1453_v60, %v1452_v21 }
 0x3f8   : > { %v3512_v31 = vpop.eup %3511  ;;  %3284 = vmatpush3.bf16.xpose.msra.mxu0 %v1914_v11 }
 0x3f9   : > { %3233 = vmatprep.mubr.bf16.mxu0 %v1462_v19  ;;  %v1455_v35 = vmul.f32 %v3512_v31, %v4385_v54 }
 0x3fa   : > { %v1866_v4 = vpop.permute.xlu0 %1865  ;;  %v1872_v54 = vpop.permute.xlu1 %1871 }
 0x3fb   : > { %v1463_v25 = vpack.c.bf16 %v1455_v35, %v1454_v56 }
 0x3fd   : > { %3234 = vmatmul.mubr.bf16.gmra.mxu0 %v1463_v25 }
 0x3fe   : > { %3285 = vmatprep.mubr.msk.bf16.mxu0 %vm918_vm1, %v1858_v18  ;;  %v1870_v2 = vpop.permute.xlu0 %1869  ;;  %v1792_v36 = vpop.permute.xlu1 %1791 }
 0x402   : > { %v1788_v52 = vpop.permute.xlu0 %1787  ;;  %v1800_v16 = vpop.permute.xlu1 %1799 }
 0x405   : > { %3286 = vmatmul.mubr.msk.bf16.vlgmr.msra.gmra.mxu0 %vm918_vm1, %v1860_v6 }
 0x406   : > { %3289 = vmatprep.mubr.msk.bf16.mxu0 %vm918_vm1, %v1862_v32  ;;  %v1796_v44 = vpop.permute.xlu0 %1795  ;;  %v1808_v60 = vpop.permute.xlu1 %1807 }
 0x40a   : > { %v1804_v8 = vpop.permute.xlu0 %1803  ;;  %v1816_v6 = vpop.permute.xlu1 %1815 }
 0x40d   : > { %3290 = vmatmul.mubr.msk.bf16.gmra.mxu0 %vm918_vm1, %v1864_v28 }
 0x40e   : > { %3293 = vmatprep.mubr.msk.bf16.mxu0 %vm918_vm1, %v1866_v4  ;;  %v1812_v25 = vpop.permute.xlu0 %1811 }
 0x415   : > { %3294 = vmatmul.mubr.msk.bf16.gmra.mxu0 %vm918_vm1, %v1868_v57 }
 0x416   : > { %3297 = vmatprep.mubr.msk.bf16.mxu0 %vm918_vm1, %v1870_v2 }
 0x41d   : > { %3298 = vmatmul.mubr.msk.bf16.gmra.mxu0 %vm918_vm1, %v1872_v54 }
 0x439   : > { %v1820_v2 = vpop.permute.xlu0 %1819 }
 0x43d   : > { %v1824_v50 = vpop.permute.xlu1 %1823  ;;  %v1828_v63 = vpop.permute.xlu0 %1827 }
 0x45e   : > { %v3267_v48 = vpop.f32.mrf.mxu1 }
 0x460   : > { %v1771_v12 = vpop.f32.mrf.mxu1 }
 0x461   : > { %1835 = vrot.lane.b32.xlu0 %v1771_v12, %s3642_s27 }
 0x462   : > { %v3268_v61 = vpop.f32.mrf.mxu1 }
 0x464   : > { %v1774_v55 = vpop.f32.mrf.mxu1 }
 0x465   : > { %1843 = vrot.lane.b32.xlu0 %v3267_v48, %s3640_s26  ;;  %1839 = vrot.lane.b32.xlu1 %v1774_v55, %s3644_s11 }
 0x469   : > { %1847 = vrot.lane.b32.xlu1 %v3268_v61, %s3643_s28 }
 0x46d   : > { %2216 = vrot.lane.b32.xlu1 %v3922_v15, %s3645_s29  ;;  %v4473_v9 = vpop.f32.mrf.mxu0 }
 0x46f   : > { %v4475_v40 = vpop.f32.mrf.mxu0 }
 0x471   : > { %v4477_v39 = vpop.f32.mrf.mxu0 }
 0x472   : > { %v1586_v7 = vpack.c.bf16 %v4477_v39, %v4473_v9 }
 0x473   : > { %v4481_v26 = vpop.f32.mrf.mxu0 }
 0x474   : > { %v1585_v33 = vpack.c.bf16 %v4481_v26, %v4475_v40 }
 0x4a9   : > { %v4485_v49 = vpop.f32.mrf.mxu0 }
 0x4ab   : > { %v4487_v23 = vpop.f32.mrf.mxu0 }
 0x4ad   : > { %v4489_v1 = vpop.f32.mrf.mxu0 }
 0x4ae   : > { %v1588_v15 = vpack.c.bf16 %v4489_v1, %v4485_v49 }
 0x4af   : > { %v4493_v17 = vpop.f32.mrf.mxu0 }
 0x4b0   : > { %v1587_v13 = vpack.c.bf16 %v4493_v17, %v4487_v23  ;;  %v4760_v17 = vld [vmem:[%s5011_s8] ss:$0 sm:$0xff] }
 0x4b2   : > { %v4497_v3 = vpop.f32.mrf.mxu0 }
 0x4b4   : > { %v4499_v62 = vpop.f32.mrf.mxu0 }
 0x4b6   : > { %v4501_v47 = vpop.f32.mrf.mxu0 }
 0x4b7   : > { %v1590_v59 = vpack.c.bf16 %v4501_v47, %v4497_v3  ;;  %v3610_v47 = vld [vmem:[%s3725_s22] sm:$0xff]  }
 0x4b8   : > { %v4505_v30 = vpop.f32.mrf.mxu0 }
 0x4b9   : > { %v1589_v24 = vpack.c.bf16 %v4505_v30, %v4499_v62 }
 0x4bd   : > { %v4509_v34 = vpop.f32.mrf.mxu0 }
 0x4bf   : > { %v4511_v27 = vpop.f32.mrf.mxu0 }
 0x4c1   : > { %v4513_v51 = vpop.f32.mrf.mxu0 }
 0x4c2   : > { %v1592_v38 = vpack.c.bf16 %v4513_v51, %v4509_v34  ;;  %v2516_v51 = vunpack.c.h.bf16 %v3610_v47 }
 0x4c3   : > { %v4517_v21 = vpop.f32.mrf.mxu0 }
 0x4c4   : > { %v1591_v42 = vpack.c.bf16 %v4517_v21, %v4511_v27 }
 0x4c5   : > { %v3287_v11 = vpop.f32.mrf.mxu0 }
 0x4c6   : > { %v1980_v19 = vadd.f32 %v3287_v11, %v1796_v44  ;;  %v1832_v11 = vpop.permute.xlu1 %1831 }
 0x4c7   : > { %v1971_v31 = vpop.f32.mrf.mxu0 }
 0x4c8   : > { %v1972_v56 = vadd.f32 %v1971_v31, %v1788_v52  ;;  %v4524_v35 = vsel %vm904_vm7, %v1980_v19, -inf }
 0x4c9   : > { %2054 = vmax.xlane.f32.xlu0 %v4524_v35  ;;  %v3288_v18 = vpop.f32.mrf.mxu0 }
 0x4ca   : > { %v1983_v28 = vadd.f32 %v3288_v18, %v1800_v16  ;;  %v4530_v57 = vsel %vm902_vm8, %v1972_v56, -inf }
 0x4cb   : > { %v1974_v32 = vpop.f32.mrf.mxu0 }
 0x4cc   : > { %v1975_v4 = vadd.f32 %v1974_v32, %v1792_v36  ;;  %v4542_v0 = vsel %vm905_vm10, %v1983_v28, -inf }
 0x4cd   : > { %2050 = vmax.xlane.f32.xlu0 %v4530_v57  ;;  %v3291_v54 = vpop.f32.mrf.mxu0 }
 0x4ce   : > { %v1996_v48 = vadd.f32 %v3291_v54, %v1812_v25  ;;  %v4536_v12 = vsel %vm903_vm9, %v1975_v4, -inf }
 0x4cf   : > { %v1987_v61 = vpop.f32.mrf.mxu0  ;;  %2052 = vmax.xlane.f32.xlu1 %v4536_v12 }
 0x4d0   : > { %v1988_v52 = vadd.f32 %v1987_v61, %v1804_v8  ;;  %v4548_v44 = vsel %vm908_vm11, %v1996_v48, -inf }
 0x4d1   : > { %v3292_v55 = vpop.f32.mrf.mxu0  ;;  %2056 = vmax.xlane.f32.xlu0 %v4542_v0 }
 0x4d2   : > { %v1999_v36 = vadd.f32 %v3292_v55, %v1816_v6  ;;  %v4560_v41 = vsel %vm906_vm12, %v1988_v52, -inf }
 0x4d3   : > { %v1990_v16 = vpop.f32.mrf.mxu0  ;;  %2062 = vmax.xlane.f32.xlu1 %v4548_v44  ;;  %v1836_v56 = vpop.permute.xlu0 %1835 }
 0x4d4   : > { %v1991_v19 = vadd.f32 %v1990_v16, %v1808_v60  ;;  %v4554_v37 = vsel %vm909_vm15, %v1999_v36, -inf  ;;  %v5034_v16 = vld [vmem:[#allocation5_spill] sm:$0xff] }
 0x4d5   : > { %v3295_v31 = vpop.f32.mrf.mxu0  ;;  %2064 = vmax.xlane.f32.xlu0 %v4554_v37 }
 0x4d6   : > { %v2012_v8 = vadd.f32 %v3295_v31, %v1828_v63  ;;  %v4566_v43 = vsel %vm907_vm2, %v1991_v19, -inf  ;;  %vm5031_vm2 = vcmp.le.s32.totalorder %v4111_v58, %v4241_v5  ;;  %v5036_v5 = vld [vmem:[#allocation3_spill] sm:$0xff] }
 0x4d7   : > { %v2003_v25 = vpop.f32.mrf.mxu0  ;;  %2058 = vmax.xlane.f32.xlu1 %v4560_v41  ;;  %v1840_v18 = vpop.permute.xlu1 %1839 }
 0x4d8   : > { %v2004_v6 = vadd.f32 %v2003_v25, %v1820_v2  ;;  %v4572_v20 = vsel %vm912_vm13, %v2012_v8, -inf  ;;  %v1844_v48 = vpop.permute.xlu0 %1843 }
 0x4d9   : > { %v3296_v60 = vpop.f32.mrf.mxu0  ;;  %2060 = vmax.xlane.f32.xlu0 %v4566_v43 }
 0x4da   : > { %v2015_v32 = vadd.f32 %v3296_v60, %v1832_v11  ;;  %v4584_v29 = vsel %vm910_vm14, %v2004_v6, -inf  ;;  %v5035_v11 = vld [vmem:[#allocation6_spill] sm:$0xff] }
 0x4db   : > { %v2006_v28 = vpop.f32.mrf.mxu0  ;;  %2070 = vmax.xlane.f32.xlu1 %v4572_v20  ;;  %v1848_v54 = vpop.permute.xlu1 %1847 }
 0x4dc   : > { %v2007_v4 = vadd.f32 %v2006_v28, %v1824_v50  ;;  %v4578_v45 = vsel %vm913_vm3, %v2015_v32, -inf }
 0x4dd   : > { %v3299_v61 = vpop.f32.mrf.mxu0  ;;  %2072 = vmax.xlane.f32.xlu0 %v4578_v45 }
 0x4de   : > { %v2028_v2 = vadd.f32 %v3299_v61, %v1844_v48  ;;  %v4590_v14 = vsel %vm911_vm4, %v2007_v4, -inf }
 0x4df   : > { %v2019_v55 = vpop.f32.mrf.mxu0  ;;  %2066 = vmax.xlane.f32.xlu1 %v4584_v29  ;;  %v2217_v50 = vpop.permute.xlu1 %2216 }
 0x4e0   : > { %3301 = vmatprep.subr.bf16.mxu1 %v2217_v50  ;;  %v2020_v52 = vadd.f32 %v2019_v55, %v1836_v56  ;;  %v4596_v46 = vsel %vm5031_vm2, %v2028_v2, -inf }
 0x4e1   : > { %2068 = vmax.xlane.f32.xlu0 %v4590_v14  ;;  %3302 = vmatpush3.bf16.msra.mxu1 %v2217_v50  ;;  %v3300_v19 = vpop.f32.mrf.mxu0 }
 0x4e2   : > { %v4602_v63 = vsel %vm914_vm0, %v2020_v52, -inf  ;;  %v2031_v31 = vadd.f32 %v3300_v19, %v1848_v54  ;;  %vm5040_vm0 = vcmask 261120  }
 0x4e3   : > { %2078 = vmax.xlane.f32.xlu1 %v4596_v46  ;;  %v2022_v8 = vpop.f32.mrf.mxu0  ;;  %vm5041_vm3 = vmmov %vm5040_vm0 }
 0x4e4   : > { %v2023_v56 = vadd.f32 %v2022_v8, %v1840_v18  ;;  %v4618_v60 = vsel %vm917_vm5, %v2031_v31, -inf  ;;  %vm5042_vm4 = vmmov %vm5040_vm0 }
 0x4e5   : > { %vm5043_vm5 = vmmov %vm5040_vm0 }
 0x4e6   : > { %v4624_v32 = vsel %vm915_vm6, %v2023_v56, -inf  ;;  %vm5044_vm6 = vmmov %vm5040_vm0 }
 0x4e7   : > { %2074 = vmax.xlane.f32.xlu1 %v4602_v63  ;;  %vm5045_vm7 = vmmov %vm5040_vm0 }
 0x4e8   : > { %vm5046_vm8 = vmmov %vm5040_vm0 }
 0x4e9   : > { %vm5047_vm9 = vmmov %vm5040_vm0 }
 0x4ea   : > { %vm5049_vm10 = vmmov %vm5040_vm0 }
 0x4eb   : > { %vm5050_vm11 = vmmov %vm5040_vm0 }
 0x4ec   : > { %vm5051_vm12 = vmmov %vm5040_vm0 }
 0x4ed   : > { %vm5052_vm13 = vmmov %vm5040_vm0 }
 0x4ee   : > { %vm5053_vm14 = vmmov %vm5040_vm0 }
 0x4ef   : > { %vm5054_vm15 = vmmov %vm5040_vm0 }
 0x4f0   : > { %vm5055_vm2 = vmmov %vm5040_vm0 }
 0x4f7   : > { %2212 = vrot.lane.b32.xlu0 %v5033_v22, %s3645_s29 }
 0x4f8   : > { %2214 = vrot.lane.b32.xlu1 %v5034_v16, %s3645_s29 }
 0x4fb   : > { %2208 = vrot.lane.b32.xlu0 %v5035_v11, %s3645_s29 }
 0x4fc   : > { %2210 = vrot.lane.b32.xlu1 %v5036_v5, %s3645_s29 }
 0x500   : > { %2204 = vrot.lane.b32.xlu1 %v3966_v53, %s3645_s29  ;;  %v5039_v53 = vld [vmem:[#allocation4_spill] sm:$0xff] }
 0x51a   : > { %2080 = vmax.xlane.f32.xlu0 %v4618_v60 }
 0x51e   : > { %2076 = vmax.xlane.f32.xlu0 %v4624_v32 }
 0x534   : > { %2206 = vrot.lane.b32.xlu0 %v5039_v53, %s3645_s29 }
 0x552   : > { %v2055_v28 = vpop.xlane.xlu0 %2054 }
 0x553   : > { %v2084_v18 = vsub.f32 %v4524_v35, %v2055_v28 }
 0x555   : > { %v2102_v4 = vmul.f32 1.442695, %v2084_v18 }
 0x556   : > { %v2051_v54 = vpop.xlane.xlu0 %2050 }
 0x557   : > { %3513 = vpow2.f32 %v2102_v4  ;;  %v2082_v48 = vsub.f32 %v4530_v57, %v2051_v54 }
 0x558   : > { %v2053_v61 = vpop.xlane.xlu1 %2052 }
 0x559   : > { %v2098_v2 = vmul.f32 1.442695, %v2082_v48  ;;  %v2083_v58 = vsub.f32 %v4536_v12, %v2053_v61 }
 0x55a   : > { %v2057_v55 = vpop.xlane.xlu0 %2056 }
 0x55b   : > { %3515 = vpow2.f32 %v2098_v2  ;;  %v2085_v50 = vsub.f32 %v4542_v0, %v2057_v55  ;;  %v2100_v11 = vmul.f32 1.442695, %v2083_v58 }
 0x55c   : > { %v2063_v52 = vpop.xlane.xlu1 %2062 }
 0x55d   : > { %v2104_v36 = vmul.f32 1.442695, %v2085_v50  ;;  %v2088_v22 = vsub.f32 %v4548_v44, %v2063_v52 }
 0x55e   : > { %v2065_v16 = vpop.xlane.xlu0 %2064 }
 0x55f   : > { %3517 = vpow2.f32 %v2104_v36  ;;  %v2110_v35 = vmul.f32 1.442695, %v2088_v22  ;;  %v2089_v57 = vsub.f32 %v4554_v37, %v2065_v16 }
 0x560   : > { %v2059_v5 = vpop.xlane.xlu1 %2058 }
 0x561   : > { %3519 = vpow2.f32 %v2110_v35  ;;  %v2086_v19 = vsub.f32 %v4560_v41, %v2059_v5  ;;  %v2112_v25 = vmul.f32 1.442695, %v2089_v57 }
 0x562   : > { %v2061_v31 = vpop.xlane.xlu0 %2060  ;;  %3521 = vpow2.f32 %v2100_v11 }
 0x563   : > { %v2106_v8 = vmul.f32 1.442695, %v2086_v19  ;;  %v2087_v12 = vsub.f32 %v4566_v43, %v2061_v31 }
 0x564   : > { %v4637_v0 = vpop.eup %3513  ;;  %v2071_v56 = vpop.xlane.xlu1 %2070 }
 0x565   : > { %3523 = vpow2.f32 %v2106_v8  ;;  %v2108_v44 = vmul.f32 1.442695, %v2087_v12  ;;  %v2092_v6 = vsub.f32 %v4572_v20, %v2071_v56  ;;  %2134 = vadd.xlane.f32.xlu0 %v4637_v0 }
 0x566   : > { %v2073_v53 = vpop.xlane.xlu0 %2072 }
 0x567   : > { %3525 = vpow2.f32 %v2108_v44  ;;  %v2118_v28 = vmul.f32 1.442695, %v2092_v6  ;;  %v2093_v20 = vsub.f32 %v4578_v45, %v2073_v53 }
 0x568   : > { %v4641_v37 = vpop.eup %3515  ;;  %v2067_v41 = vpop.xlane.xlu1 %2066  ;;  %3527 = vpow2.f32 %v2112_v25 }
 0x569   : > { %v2090_v18 = vsub.f32 %v4584_v29, %v2067_v41  ;;  %2130 = vadd.xlane.f32.xlu0 %v4641_v37  ;;  %3529 = vpow2.f32 %v2118_v28  ;;  %v2120_v52 = vmul.f32 1.442695, %v2093_v20 }
 0x56a   : > { %v2069_v43 = vpop.xlane.xlu0 %2068 }
 0x56b   : > { %v2091_v4 = vsub.f32 %v4590_v14, %v2069_v43  ;;  %v2114_v61 = vmul.f32 1.442695, %v2090_v18 }
 0x56c   : > { %v4646_v54 = vpop.eup %3517  ;;  %v2079_v48 = vpop.xlane.xlu1 %2078 }
 0x56d   : > { %v2116_v2 = vmul.f32 1.442695, %v2091_v4  ;;  %v2096_v55 = vsub.f32 %v4596_v46, %v2079_v48  ;;  %2136 = vadd.xlane.f32.xlu0 %v4646_v54 }
 0x56e   : > { %v4651_v58 = vpop.eup %3519  ;;  %v2213_v35 = vpop.permute.xlu0 %2212 }
 0x56f   : > { %3531 = vpow2.f32 %v2116_v2  ;;  %v2126_v29 = vmul.f32 1.442695, %v2096_v55  ;;  %2142 = vadd.xlane.f32.xlu1 %v4651_v58  ;;  %v4654_v50 = vpop.eup %3521 }
 0x570   : > { %v2075_v14 = vpop.xlane.xlu1 %2074  ;;  %3533 = vpow2.f32 %v2114_v61 }
 0x571   : > { %v2094_v45 = vsub.f32 %v4602_v63, %v2075_v14  ;;  %2132 = vadd.xlane.f32.xlu0 %v4654_v50  ;;  %3535 = vpow2.f32 %v2126_v29 }
 0x572   : > { %v4658_v36 = vpop.eup %3523  ;;  %3537 = vpow2.f32 %v2120_v52  ;;  %v2209_v31 = vpop.permute.xlu0 %2208 }
 0x573   : > { %2138 = vadd.xlane.f32.xlu1 %v4658_v36  ;;  %v2122_v16 = vmul.f32 1.442695, %v2094_v45 }
 0x574   : > { %v4661_v46 = vpop.eup %3525  ;;  %v2215_v22 = vpop.permute.xlu1 %2214 }
 0x575   : > { %2140 = vadd.xlane.f32.xlu0 %v4661_v46  ;;  %3303 = vmatprep.subr.bf16.mxu1 %v2215_v22  ;;  %v4664_v11 = vpop.eup %3527  ;;  %3539 = vpow2.f32 %v2122_v16 }
 0x576   : > { %3304 = vmatpush3.bf16.msra.mxu1 %v2215_v22  ;;  %v4667_v63 = vpop.eup %3529 }
 0x577   : > { %2144 = vadd.xlane.f32.xlu1 %v4664_v11  ;;  %3305 = vmatprep.subr.bf16.mxu1 %v2213_v35 }
 0x578   : > { %v2211_v5 = vpop.permute.xlu1 %2210 }
 0x57a   : > { %3306 = vmatpush3.bf16.msra.mxu1 %v2213_v35 }
 0x57b   : > { %2150 = vadd.xlane.f32.xlu1 %v4667_v63  ;;  %3307 = vmatprep.subr.bf16.mxu1 %v2211_v5 }
 0x57c   : > { %v4670_v57 = vpop.eup %3531  ;;  %v2205_v43 = vpop.permute.xlu1 %2204 }
 0x57d   : > { %2148 = vadd.xlane.f32.xlu0 %v4670_v57  ;;  %v4673_v19 = vpop.eup %3533 }
 0x57e   : > { %3308 = vmatpush3.bf16.msra.mxu1 %v2211_v5  ;;  %v4676_v8 = vpop.eup %3535 }
 0x57f   : > { %2146 = vadd.xlane.f32.xlu1 %v4673_v19  ;;  %3309 = vmatprep.subr.bf16.mxu1 %v2209_v31  ;;  %v4679_v12 = vpop.eup %3537 }
 0x581   : > { %2158 = vadd.xlane.f32.xlu0 %v4676_v8 }
 0x582   : > { %3310 = vmatpush3.bf16.msra.mxu1 %v2209_v31  ;;  %v4682_v56 = vpop.eup %3539 }
 0x583   : > { %2152 = vadd.xlane.f32.xlu1 %v4679_v12 }
 0x587   : > { %2154 = vadd.xlane.f32.xlu1 %v4682_v56 }
 0x5a3   : > { %v2081_v25 = vpop.xlane.xlu0 %2080 }
 0x5a4   : > { %v2097_v44 = vsub.f32 %v4618_v60, %v2081_v25 }
 0x5a6   : > { %v2128_v6 = vmul.f32 1.442695, %v2097_v44 }
 0x5a7   : > { %v2077_v53 = vpop.xlane.xlu0 %2076 }
 0x5a8   : > { %3541 = vpow2.f32 %v2128_v6  ;;  %v2095_v41 = vsub.f32 %v4624_v32, %v2077_v53 }
 0x5aa   : > { %v2124_v28 = vmul.f32 1.442695, %v2095_v41 }
 0x5ab   : > { %v2207_v18 = vpop.permute.xlu0 %2206 }
 0x5ac   : > { %3543 = vpow2.f32 %v2124_v28  ;;  %3311 = vmatprep.subr.bf16.mxu1 %v2207_v18 }
 0x5ad   : > { %3312 = vmatpush3.bf16.msra.mxu1 %v2207_v18 }
 0x5ae   : > { %3313 = vmatprep.subr.bf16.mxu1 %v2205_v43 }
 0x5b1   : > { %3314 = vmatpush3.bf16.msra.mxu1 %v2205_v43 }
 0x5b5   : > { %v4687_v4 = vpop.eup %3541 }
 0x5b6   : > { %2160 = vadd.xlane.f32.xlu1 %v4687_v4 }
 0x5b9   : > { %v4690_v20 = vpop.eup %3543 }
 0x5ba   : > { %2156 = vadd.xlane.f32.xlu0 %v4690_v20 }
 0x5d0   : > { %2202 = vrot.lane.b32.xlu0 %v3929_v10, %s3645_s29 }
 0x5ee   : > { %v2135_v60 = vpop.xlane.xlu0 %2134 }
 0x5ef   : > { %3545 = vrcp.f32 %v2135_v60 }
 0x5f2   : > { %v2131_v32 = vpop.xlane.xlu0 %2130 }
 0x5f6   : > { %v2137_v48 = vpop.xlane.xlu0 %2136 }
 0x5f7   : > { %3547 = vrcp.f32 %v2137_v48 }
 0x5f8   : > { %3549 = vrcp.f32 %v2131_v32  ;;  %v2143_v5 = vpop.xlane.xlu1 %2142 }
 0x5fa   : > { %v2133_v61 = vpop.xlane.xlu0 %2132 }
 0x5fb   : > { %3551 = vrcp.f32 %v2133_v61 }
 0x5fc   : > { %v3546_v2 = vpop.eup %3545  ;;  %v2139_v31 = vpop.xlane.xlu1 %2138 }
 0x5fd   : > { %v2180_v29 = vmul.f32 %v3546_v2, %v4637_v0 }
 0x5fe   : > { %v2141_v44 = vpop.xlane.xlu0 %2140 }
 0x5ff   : > { %3553 = vrcp.f32 %v2141_v44 }
 0x600   : > { %v2145_v25 = vpop.xlane.xlu1 %2144  ;;  %3555 = vrcp.f32 %v2139_v31 }
 0x601   : > { %3557 = vrcp.f32 %v2145_v25 }
 0x604   : > { %v3548_v55 = vpop.eup %3547  ;;  %v2151_v6 = vpop.xlane.xlu1 %2150 }
 0x605   : > { %v2181_v14 = vmul.f32 %v3548_v55, %v4646_v54  ;;  %v3550_v52 = vpop.eup %3549 }
 0x606   : > { %v2178_v16 = vmul.f32 %v3550_v52, %v4641_v37  ;;  %v2149_v53 = vpop.xlane.xlu0 %2148 }
 0x607   : > { %v2195_v45 = vpack.c.bf16 %v2181_v14, %v2180_v29 }
 0x608   : > { %v3552_v22 = vpop.eup %3551  ;;  %v2147_v0 = vpop.xlane.xlu1 %2146 }
 0x609   : > { %v2179_v10 = vmul.f32 %v3552_v22, %v4654_v50  ;;  %3559 = vrcp.f32 %v2147_v0 }
 0x60a   : > { %v2159_v54 = vpop.xlane.xlu0 %2158  ;;  %3561 = vrcp.f32 %v2143_v5 }
 0x60b   : > { %v2194_v35 = vpack.c.bf16 %v2179_v10, %v2178_v16  ;;  %3563 = vrcp.f32 %v2149_v53 }
 0x60c   : > { %v2153_v41 = vpop.xlane.xlu1 %2152  ;;  %v3554_v28 = vpop.eup %3553 }
 0x60d   : > { %3317 = vmatprep.mubr.bf16.mxu1 %v2194_v35  ;;  %v3556_v50 = vpop.eup %3555  ;;  %3565 = vrcp.f32 %v2153_v41  ;;  %v2183_v60 = vmul.f32 %v3554_v28, %v4661_v46 }
 0x60e   : > { %v2182_v32 = vmul.f32 %v3556_v50, %v4658_v36  ;;  %v3558_v48 = vpop.eup %3557 }
 0x60f   : > { %v2185_v52 = vmul.f32 %v3558_v48, %v4664_v11 }
 0x610   : > { %v2155_v18 = vpop.xlane.xlu1 %2154  ;;  %v2196_v2 = vpack.c.bf16 %v2183_v60, %v2182_v32 }
 0x616   : > { %v3560_v55 = vpop.eup %3559 }
 0x617   : > { %v3562_v29 = vpop.eup %3561  ;;  %v2186_v22 = vmul.f32 %v3560_v55, %v4673_v19 }
 0x618   : > { %v3564_v14 = vpop.eup %3563  ;;  %v2184_v46 = vmul.f32 %v3562_v29, %v4651_v58 }
 0x619   : > { %v2187_v16 = vmul.f32 %v3564_v14, %v4670_v57 }
 0x61a   : > { %v2197_v10 = vpack.c.bf16 %v2185_v52, %v2184_v46  ;;  %v3566_v36 = vpop.eup %3565 }
 0x61b   : > { %v2198_v35 = vpack.c.bf16 %v2187_v16, %v2186_v22  ;;  %v2189_v25 = vmul.f32 %v3566_v36, %v4679_v12  ;;  %v3439_v12 = vld [vmem:[%s5008_s5 + $0x8] sm:$0xff]  }
 0x61c   : > { %3333 = vmatprep.subr.bf16.mxu0 %v3439_v12 }
 0x61d   : > { %3334 = vmatpush3.bf16.msra.mxu0 %v3439_v12 }
 0x63f   : > { %v2161_v61 = vpop.xlane.xlu1 %2160 }
 0x643   : > { %v2157_v37 = vpop.xlane.xlu0 %2156 }
 0x644   : > { %3567 = vrcp.f32 %v2157_v37 }
 0x645   : > { %3569 = vrcp.f32 %v2151_v6 }
 0x646   : > { %3571 = vrcp.f32 %v2155_v18 }
 0x647   : > { %v2203_v43 = vpop.permute.xlu0 %2202  ;;  %3573 = vrcp.f32 %v2161_v61 }
 0x648   : > { %3315 = vmatprep.subr.bf16.mxu1 %v2203_v43  ;;  %3575 = vrcp.f32 %v2159_v54 }
 0x649   : > { %3316 = vmatpush3.bf16.msra.mxu1 %v2203_v43 }
 0x64a   : > { %3353 = vmatprep.subr.bf16.mxu1 %v3439_v12 }
 0x64c   : > { %3318 = vmatmul.mubr.bf16.vlgmr.msra.gmra.mxu1 %v2195_v45 }
 0x64d   : > { %3321 = vmatprep.mubr.bf16.mxu1 %v2196_v2  ;;  %3355 = vmatpush3.bf16.msra.mxu1 %v3439_v12 }
 0x651   : > { %v3568_v5 = vpop.eup %3567 }
 0x652   : > { %v3570_v31 = vpop.eup %3569  ;;  %v2191_v44 = vmul.f32 %v3568_v5, %v4690_v20 }
 0x653   : > { %v3572_v45 = vpop.eup %3571  ;;  %v2188_v11 = vmul.f32 %v3570_v31, %v4667_v63  ;;  %v3440_v63 = vld [vmem:[%s5008_s5] sm:$0xff]  }
 0x654   : > { %3322 = vmatmul.mubr.bf16.gmra.mxu1 %v2197_v10  ;;  %v2190_v19 = vmul.f32 %v3572_v45, %v4682_v56  ;;  %v3574_v58 = vpop.eup %3573  ;;  %3335 = vmatprep.subr.bf16.mxu0 %v3440_v63 }
 0x655   : > { %3325 = vmatprep.mubr.bf16.mxu1 %v2198_v35  ;;  %v2199_v6 = vpack.c.bf16 %v2189_v25, %v2188_v11  ;;  %v3576_v57 = vpop.eup %3575  ;;  %v2193_v0 = vmul.f32 %v3574_v58, %v4687_v4  ;;  %3354 = vmatprep.subr.bf16.mxu1 %v3440_v63 }
 0x656   : > { %v2200_v53 = vpack.c.bf16 %v2191_v44, %v2190_v19  ;;  %v2192_v54 = vmul.f32 %v3576_v57, %v4676_v8  ;;  %3336 = vmatpush3.bf16.msra.mxu0 %v3440_v63  ;;  %3356 = vmatpush3.bf16.msra.mxu1 %v3440_v63 }
 0x658   : > { %v2201_v41 = vpack.c.bf16 %v2193_v0, %v2192_v54 }
 0x65c   : > { %3326 = vmatmul.mubr.bf16.gmra.mxu1 %v2199_v6 }
 0x65d   : > { %3329 = vmatprep.mubr.bf16.mxu1 %v2200_v53 }
 0x664   : > { %3330 = vmatmul.mubr.bf16.gmra.mxu1 %v2201_v41  ;;  %v3611_v41 = vld [vmem:[%s3725_s22 + $0x18] sm:$0xff]  }
 0x665   : > { %v2521_v12 = vunpack.c.l.bf16 %v3611_v41 }
 0x70c   : > { %v3319_v56 = vpop.f32.mrf.mxu1 }
 0x70e   : > { %v2260_v8 = vpop.f32.mrf.mxu1 }
 0x710   : > { %v3320_v4 = vpop.f32.mrf.mxu1 }
 0x711   : > { %v2324_v20 = vpack.c.bf16 %v3320_v4, %v3319_v56  ;;  %v3612_v4 = vld [vmem:[%s3725_s22 + $0x10] sm:$0xff]  }
 0x712   : > { %v2263_v37 = vpop.f32.mrf.mxu1 }
 0x713   : > { %v2323_v28 = vpack.c.bf16 %v2263_v37, %v2260_v8  ;;  %2341 = vrot.lane.b32.xlu0 %v2324_v20, %s3646_s16  ;;  %v2519_v20 = vunpack.c.l.bf16 %v3612_v4 }
 0x714   : > { %v3323_v50 = vpop.f32.mrf.mxu1 }
 0x715   : > { %2339 = vrot.lane.b32.xlu1 %v2323_v28, %s3646_s16 }
 0x716   : > { %v2276_v18 = vpop.f32.mrf.mxu1 }
 0x718   : > { %v3324_v43 = vpop.f32.mrf.mxu1 }
 0x719   : > { %v2326_v2 = vpack.c.bf16 %v3324_v43, %v3323_v50  ;;  %v2522_v43 = vunpack.c.h.bf16 %v3611_v41 }
 0x71a   : > { %v2279_v60 = vpop.f32.mrf.mxu1 }
 0x71b   : > { %v2325_v32 = vpack.c.bf16 %v2279_v60, %v2276_v18 }
 0x71c   : > { %v3327_v48 = vpop.f32.mrf.mxu1 }
 0x71d   : > { %2343 = vrot.lane.b32.xlu0 %v2325_v32, %s3646_s16 }
 0x71e   : > { %v2292_v61 = vpop.f32.mrf.mxu1 }
 0x720   : > { %v3328_v55 = vpop.f32.mrf.mxu1 }
 0x721   : > { %2345 = vrot.lane.b32.xlu0 %v2326_v2, %s3646_s16  ;;  %v2328_v46 = vpack.c.bf16 %v3328_v55, %v3327_v48 }
 0x722   : > { %v2295_v29 = vpop.f32.mrf.mxu1 }
 0x723   : > { %v2327_v14 = vpack.c.bf16 %v2295_v29, %v2292_v61  ;;  %v2520_v61 = vunpack.c.h.bf16 %v3612_v4 }
 0x724   : > { %v3331_v52 = vpop.f32.mrf.mxu1 }
 0x725   : > { %2347 = vrot.lane.b32.xlu1 %v2327_v14, %s3646_s16 }
 0x726   : > { %v2308_v22 = vpop.f32.mrf.mxu1 }
 0x728   : > { %v3332_v16 = vpop.f32.mrf.mxu1 }
 0x729   : > { %2349 = vrot.lane.b32.xlu1 %v2328_v46, %s3646_s16  ;;  %v2330_v35 = vpack.c.bf16 %v3332_v16, %v3331_v52  ;;  %v3613_v52 = vld [vmem:[%s3725_s22 + $0x28] sm:$0xff]   ;;  %v3614_v16 = vld [vmem:[%s3725_s22 + $0x20] sm:$0xff]  }
 0x72a   : > { %v2311_v10 = vpop.f32.mrf.mxu1 }
 0x72b   : > { %v2329_v36 = vpack.c.bf16 %v2311_v10, %v2308_v22  ;;  %v2525_v22 = vunpack.c.l.bf16 %v3613_v52  ;;  %v2523_v10 = vunpack.c.l.bf16 %v3614_v16 }
 0x72d   : > { %2351 = vrot.lane.b32.xlu1 %v2329_v36, %s3646_s16 }
 0x731   : > { %2353 = vrot.lane.b32.xlu1 %v2330_v35, %s3646_s16 }
 0x785   : > { %v2342_v5 = vpop.permute.xlu0 %2341 }
 0x786   : > { %v2360_v25 = vsel %vm918_vm1, %v1586_v7, %v2342_v5 }
 0x787   : > { %v2340_v31 = vpop.permute.xlu1 %2339 }
 0x788   : > { %v2357_v45 = vsel %vm918_vm1, %v1585_v33, %v2340_v31 }
 0x789   : > { %3337 = vmatprep.mubr.msk.bf16.mxu0 %vm5040_vm0, %v2357_v45 }
 0x78a   : > { %3338 = vmatmul.mubr.msk.bf16.vlgmr.msra.gmra.mxu0 %vm5041_vm3, %v2360_v25  ;;  %vm5056_vm3 = vmmov %vm5040_vm0 }
 0x78f   : > { %v2344_v44 = vpop.permute.xlu0 %2343 }
 0x790   : > { %v2363_v11 = vsel %vm918_vm1, %v1587_v13, %v2344_v44  ;;  %v3609_v13 = vld [vmem:[%s3725_s22 + $0x8] sm:$0xff]  }
 0x791   : > { %3341 = vmatprep.mubr.msk.bf16.mxu0 %vm5042_vm4, %v2363_v11  ;;  %v2517_v3 = vunpack.c.l.bf16 %v3609_v13  ;;  %v2518_v19 = vunpack.c.h.bf16 %v3609_v13  ;;  %v2526_v11 = vunpack.c.h.bf16 %v3613_v52  ;;  %vm5057_vm4 = vmmov %vm5040_vm0 }
 0x793   : > { %v2346_v40 = vpop.permute.xlu0 %2345 }
 0x794   : > { %v2366_v9 = vsel %vm918_vm1, %v1588_v15, %v2346_v40 }
 0x795   : > { %3342 = vmatmul.mubr.msk.bf16.gmra.mxu0 %vm5043_vm5, %v2366_v9  ;;  %v2524_v9 = vunpack.c.h.bf16 %v3614_v16  ;;  %vm5058_vm5 = vmmov %vm5040_vm0 }
 0x797   : > { %v2348_v39 = vpop.permute.xlu1 %2347 }
 0x798   : > { %v2369_v7 = vsel %vm918_vm1, %v1589_v24, %v2348_v39 }
 0x799   : > { %3345 = vmatprep.mubr.msk.bf16.mxu1 %vm5044_vm6, %v2369_v7  ;;  %vm5059_vm6 = vmmov %vm5040_vm0 }
 0x79b   : > { %v2350_v26 = vpop.permute.xlu1 %2349 }
 0x79c   : > { %v2372_v33 = vsel %vm918_vm1, %v1590_v59, %v2350_v26  ;;  %v2515_v59 = vunpack.c.l.bf16 %v3610_v47  ;;  %v3615_v47 = vld [vmem:[%s3725_s22 + $0x30] sm:$0xff]  }
 0x79d   : > { %3346 = vmatmul.mubr.msk.bf16.vlgmr.msra.gmra.mxu1 %vm5045_vm7, %v2372_v33  ;;  %vm5060_vm7 = vmmov %vm5040_vm0 }
 0x79f   : > { %v2352_v49 = vpop.permute.xlu1 %2351 }
 0x7a0   : > { %v2375_v23 = vsel %vm918_vm1, %v1591_v42, %v2352_v49 }
 0x7a1   : > { %3349 = vmatprep.mubr.msk.bf16.mxu1 %vm5046_vm8, %v2375_v23  ;;  %vm5061_vm8 = vmmov %vm5040_vm0 }
 0x7a3   : > { %v2354_v1 = vpop.permute.xlu1 %2353 }
 0x7a4   : > { %v2378_v15 = vsel %vm918_vm1, %v1592_v38, %v2354_v1  ;;  %vm5048_vm1 = vmmov %vm5040_vm0 }
 0x7a5   : > { %3350 = vmatmul.mubr.msk.bf16.gmra.mxu1 %vm5047_vm9, %v2378_v15  ;;  %vm5062_vm9 = vmmov %vm5040_vm0 }
 0x84a   : > { %v3339_v62 = vpop.f32.mrf.mxu0 }
 0x84b   : > { %v2461_v30 = vadd.f32 %v3339_v62, %v4760_v17 }
 0x84c   : > { %v2452_v24 = vpop.f32.mrf.mxu0 }
 0x84d   : > { %v4765_v27 = vadd.f32 %v2517_v3, %v2461_v30  ;;  %v2453_v34 = vadd.f32 %v4760_v17, %v2452_v24 }
 0x84e   : > { %v3340_v38 = vpop.f32.mrf.mxu0 }
 0x84f   : > { %v4768_v21 = vadd.f32 %v2515_v59, %v2453_v34  ;;  %v2464_v42 = vadd.f32 %v3340_v38, %v4760_v17  ;;  %v2553_v6 = vsel %vm5048_vm1, %v4765_v27, 0.0  ;;  %v2527_v59 = vunpack.c.l.bf16 %v3615_v47  ;;  %v3616_v34 = vld [vmem:[%s3725_s22 + $0x38] sm:$0xff]   ;;  %vm5063_vm1 = vmmov %vm5040_vm0  ;;  %s2935_s22 = sshll.u32 %s5094_s10, 7 }
 0x850   : > { %2554 = vadd.xlane.f32.xlu0 %v2553_v6  ;;  %v2455_v58 = vpop.f32.mrf.mxu0  ;;  %s4950_s23 = scalar_lea.vmem %s5012_s9, %s2935_s22 }
 0x851   : > { %v2456_v53 = vadd.f32 %v4760_v17, %v2455_v58  ;;  %v4774_v57 = vadd.f32 %v2518_v19, %v2464_v42  ;;  %v2547_v54 = vsel %vm5049_vm10, %v4768_v21, 0.0  ;;  %v2528_v58 = vunpack.c.h.bf16 %v3615_v47  ;;  %vm5064_vm10 = vmmov %vm5040_vm0 }
 0x853   : > { %v4776_v0 = vadd.f32 %v2516_v51, %v2456_v53  ;;  %v2556_v28 = vsel %vm5051_vm12, %v4774_v57, 0.0  ;;  %v2529_v51 = vunpack.c.l.bf16 %v3616_v34  ;;  %v2530_v53 = vunpack.c.h.bf16 %v3616_v34  ;;  %vm5066_vm12 = vmmov %vm5040_vm0 }
 0x854   : > { %2548 = vadd.xlane.f32.xlu0 %v2547_v54 }
 0x855   : > { %v3343_v63 = vpop.f32.mrf.mxu0  ;;  %v2550_v56 = vsel %vm5050_vm11, %v4776_v0, 0.0  ;;  %vm5065_vm11 = vmmov %vm5040_vm0 }
 0x856   : > { %v2477_v8 = vadd.f32 %v3343_v63, %v4760_v17  ;;  %2551 = vadd.xlane.f32.xlu1 %v2550_v56 }
 0x857   : > { %v2468_v37 = vpop.f32.mrf.mxu0 }
 0x858   : > { %v4787_v50 = vadd.f32 %v2521_v12, %v2477_v8  ;;  %v2469_v18 = vadd.f32 %v4760_v17, %v2468_v37  ;;  %2557 = vadd.xlane.f32.xlu0 %v2556_v28 }
 0x859   : > { %v3344_v60 = vpop.f32.mrf.mxu0 }
 0x85a   : > { %v4790_v32 = vadd.f32 %v2519_v20, %v2469_v18  ;;  %v2480_v48 = vadd.f32 %v3344_v60, %v4760_v17  ;;  %v2565_v2 = vsel %vm5052_vm13, %v4787_v50, 0.0  ;;  %vm5067_vm13 = vmmov %vm5040_vm0 }
 0x85b   : > { %v2471_v55 = vpop.f32.mrf.mxu0  ;;  %2566 = vadd.xlane.f32.xlu1 %v2565_v2 }
 0x85c   : > { %v4795_v29 = vadd.f32 %v2522_v43, %v2480_v48  ;;  %v2472_v14 = vadd.f32 %v4760_v17, %v2471_v55  ;;  %v2559_v5 = vsel %vm5053_vm14, %v4790_v32, 0.0  ;;  %vm5068_vm14 = vmmov %vm5040_vm0 }
 0x85d   : > { %v3347_v46 = vpop.f32.mrf.mxu1 }
 0x85e   : > { %v4800_v36 = vadd.f32 %v2520_v61, %v2472_v14  ;;  %v2493_v35 = vadd.f32 %v3347_v46, %v4760_v17  ;;  %v2568_v31 = vsel %vm5054_vm15, %v4795_v29, 0.0  ;;  %vm5069_vm15 = vmmov %vm5040_vm0 }
 0x85f   : > { %2560 = vadd.xlane.f32.xlu1 %v2559_v5  ;;  %2569 = vadd.xlane.f32.xlu0 %v2568_v31  ;;  %v2484_v45 = vpop.f32.mrf.mxu1 }
 0x860   : > { %v4807_v25 = vadd.f32 %v2525_v22, %v2493_v35  ;;  %v2485_v44 = vadd.f32 %v4760_v17, %v2484_v45  ;;  %v2562_v26 = vsel %vm5055_vm2, %v4800_v36, 0.0  ;;  %vm5070_vm2 = vmmov %vm5040_vm0 }
 0x861   : > { %v3348_v40 = vpop.f32.mrf.mxu1 }
 0x862   : > { %v4810_v39 = vadd.f32 %v2523_v10, %v2485_v44  ;;  %v2496_v7 = vadd.f32 %v3348_v40, %v4760_v17  ;;  %v2577_v33 = vsel %vm5040_vm0, %v4807_v25, 0.0 }
 0x863   : > { %2563 = vadd.xlane.f32.xlu0 %v2562_v26  ;;  %2578 = vadd.xlane.f32.xlu1 %v2577_v33  ;;  %v2487_v49 = vpop.f32.mrf.mxu1 }
 0x864   : > { %v4817_v23 = vadd.f32 %v2526_v11, %v2496_v7  ;;  %v2488_v1 = vadd.f32 %v4760_v17, %v2487_v49  ;;  %v2571_v62 = vsel %vm5057_vm4, %v4810_v39, 0.0  ;;  %vm5072_vm4 = vmmov %vm5040_vm0 }
 0x865   : > { %v3351_v15 = vpop.f32.mrf.mxu1 }
 0x866   : > { %v4820_v13 = vadd.f32 %v2524_v9, %v2488_v1  ;;  %v2580_v3 = vsel %vm5056_vm3, %v4817_v23, 0.0  ;;  %v2509_v24 = vadd.f32 %v3351_v15, %v4760_v17  ;;  %vm5071_vm3 = vmmov %vm5040_vm0 }
 0x867   : > { %2581 = vadd.xlane.f32.xlu0 %v2580_v3  ;;  %2572 = vadd.xlane.f32.xlu1 %v2571_v62  ;;  %v2500_v30 = vpop.f32.mrf.mxu1 }
 0x868   : > { %v2501_v38 = vadd.f32 %v4760_v17, %v2500_v30  ;;  %v2574_v6 = vsel %vm5058_vm5, %v4820_v13, 0.0  ;;  %v4834_v41 = vadd.f32 %v2529_v51, %v2509_v24  ;;  %vm5073_vm5 = vmmov %vm5040_vm0 }
 0x869   : > { %v3352_v42 = vpop.f32.mrf.mxu1 }
 0x86a   : > { %v4830_v19 = vadd.f32 %v2527_v59, %v2501_v38  ;;  %v2512_v12 = vadd.f32 %v3352_v42, %v4760_v17  ;;  %v2589_v37 = vsel %vm5061_vm8, %v4834_v41, 0.0  ;;  %vm5076_vm8 = vmmov %vm5040_vm0 }
 0x86b   : > { %2575 = vadd.xlane.f32.xlu0 %v2574_v6  ;;  %v2503_v54 = vpop.f32.mrf.mxu1 }
 0x86c   : > { %v2504_v63 = vadd.f32 %v4760_v17, %v2503_v54  ;;  %v2583_v56 = vsel %vm5059_vm6, %v4830_v19, 0.0  ;;  %v4842_v4 = vadd.f32 %v2530_v53, %v2512_v12  ;;  %vm5074_vm6 = vmmov %vm5040_vm0 }
 0x86d   : > { %2584 = vadd.xlane.f32.xlu1 %v2583_v56 }
 0x86e   : > { %v4840_v8 = vadd.f32 %v2528_v58, %v2504_v63  ;;  %v2592_v28 = vsel %vm5062_vm9, %v4842_v4, 0.0  ;;  %vm5077_vm9 = vmmov %vm5040_vm0 }
 0x870   : > { %v2586_v20 = vsel %vm5060_vm7, %v4840_v8, 0.0  ;;  %vm5075_vm7 = vmmov %vm5040_vm0 }
 0x871   : > { %2587 = vadd.xlane.f32.xlu0 %v2586_v20  ;;  %2590 = vadd.xlane.f32.xlu1 %v2589_v37 }
 0x875   : > { %2593 = vadd.xlane.f32.xlu0 %v2592_v28 }
 0x8d9   : > { %v2555_v17 = vpop.xlane.xlu0 %2554 }
 0x8da   : > { %v2598_v18 = vmul.f32 0.03125, %v2555_v17 }
 0x8dc   : > { %v4851_v43 = vsub.f32 %v4765_v27, %v2598_v18 }
 0x8dd   : > { %v2549_v60 = vpop.xlane.xlu0 %2548 }
 0x8de   : > { %v2596_v48 = vmul.f32 0.03125, %v2549_v60  ;;  %v2630_v61 = vmul.f32 %v4851_v43, %v4851_v43 }
 0x8df   : > { %v2552_v2 = vpop.xlane.xlu1 %2551 }
 0x8e0   : > { %v4856_v55 = vsub.f32 %v4768_v21, %v2596_v48  ;;  %v2597_v14 = vmul.f32 0.03125, %v2552_v2  ;;  %v2650_v52 = vsel %vm5063_vm1, %v2630_v61, 0.0  ;;  %vm5078_vm1 = vmmov %vm5040_vm0 }
 0x8e1   : > { %v2558_v22 = vpop.xlane.xlu0 %2557  ;;  %2651 = vadd.xlane.f32.xlu1 %v2650_v52 }
 0x8e2   : > { %v2599_v46 = vmul.f32 0.03125, %v2558_v22  ;;  %v2628_v16 = vmul.f32 %v4856_v55, %v4856_v55  ;;  %v4862_v27 = vsub.f32 %v4776_v0, %v2597_v14 }
 0x8e4   : > { %v4865_v10 = vsub.f32 %v4774_v57, %v2599_v46  ;;  %v2567_v35 = vpop.xlane.xlu1 %2566  ;;  %v2644_v5 = vsel %vm5064_vm10, %v2628_v16, 0.0  ;;  %v2629_v0 = vmul.f32 %v4862_v27, %v4862_v27  ;;  %vm5079_vm10 = vmmov %vm5040_vm0 }
 0x8e5   : > { %v2602_v21 = vmul.f32 0.03125, %v2567_v35  ;;  %2645 = vadd.xlane.f32.xlu1 %v2644_v5 }
 0x8e6   : > { %v2631_v31 = vmul.f32 %v4865_v10, %v4865_v10  ;;  %v2647_v15 = vsel %vm5067_vm13, %v2629_v0, 0.0  ;;  %vm5082_vm13 = vmmov %vm5040_vm0 }
 0x8e7   : > { %v4871_v45 = vsub.f32 %v4787_v50, %v2602_v21 }
 0x8e8   : > { %v2570_v44 = vpop.xlane.xlu0 %2569  ;;  %v2561_v11 = vpop.xlane.xlu1 %2560  ;;  %v2653_v40 = vsel %vm5065_vm11, %v2631_v31, 0.0  ;;  %vm5080_vm11 = vmmov %vm5040_vm0 }
 0x8e9   : > { %v2603_v57 = vmul.f32 0.03125, %v2570_v44  ;;  %v2600_v9 = vmul.f32 0.03125, %v2561_v11  ;;  %2654 = vadd.xlane.f32.xlu0 %v2653_v40  ;;  %v2634_v7 = vmul.f32 %v4871_v45, %v4871_v45 }
 0x8eb   : > { %v4879_v26 = vsub.f32 %v4795_v29, %v2603_v57  ;;  %v4882_v33 = vsub.f32 %v4790_v32, %v2600_v9  ;;  %v2662_v50 = vsel %vm5066_vm12, %v2634_v7, 0.0  ;;  %vm5081_vm12 = vmmov %vm5040_vm0 }
 0x8ec   : > { %v2564_v49 = vpop.xlane.xlu0 %2563  ;;  %2663 = vadd.xlane.f32.xlu1 %v2662_v50  ;;  %v2579_v1 = vpop.xlane.xlu1 %2578 }
 0x8ed   : > { %v2601_v3 = vmul.f32 0.03125, %v2564_v49  ;;  %v2606_v62 = vmul.f32 0.03125, %v2579_v1  ;;  %2648 = vadd.xlane.f32.xlu0 %v2647_v15  ;;  %v2632_v47 = vmul.f32 %v4882_v33, %v4882_v33  ;;  %v2635_v29 = vmul.f32 %v4879_v26, %v4879_v26 }
 0x8ef   : > { %v4891_v59 = vsub.f32 %v4800_v36, %v2601_v3  ;;  %v4894_v32 = vsub.f32 %v4807_v25, %v2606_v62  ;;  %v2656_v30 = vsel %vm5068_vm14, %v2632_v47, 0.0  ;;  %v2665_v24 = vsel %vm5069_vm15, %v2635_v29, 0.0  ;;  %vm5083_vm14 = vmmov %vm5040_vm0 }
 0x8f0   : > { %v2582_v34 = vpop.xlane.xlu0 %2581  ;;  %2657 = vadd.xlane.f32.xlu1 %v2656_v30  ;;  %v2573_v51 = vpop.xlane.xlu1 %2572  ;;  %vm5084_vm15 = vmmov %vm5040_vm0 }
 0x8f1   : > { %v2607_v38 = vmul.f32 0.03125, %v2582_v34  ;;  %v2604_v42 = vmul.f32 0.03125, %v2573_v51  ;;  %2666 = vadd.xlane.f32.xlu0 %v2665_v24  ;;  %v2638_v6 = vmul.f32 %v4894_v32, %v4894_v32  ;;  %v2633_v36 = vmul.f32 %v4891_v59, %v4891_v59 }
 0x8f3   : > { %v4903_v58 = vsub.f32 %v4817_v23, %v2607_v38  ;;  %v4906_v25 = vsub.f32 %v4810_v39, %v2604_v42  ;;  %v2674_v53 = vsel %vm5070_vm2, %v2638_v6, 0.0  ;;  %v2659_v54 = vsel %vm5040_vm0, %v2633_v36, 0.0  ;;  %vm5085_vm2 = vmmov %vm5040_vm0 }
 0x8f4   : > { %v2576_v12 = vpop.xlane.xlu0 %2575  ;;  %2675 = vadd.xlane.f32.xlu1 %v2674_v53 }
 0x8f5   : > { %v2605_v63 = vmul.f32 0.03125, %v2576_v12  ;;  %2660 = vadd.xlane.f32.xlu0 %v2659_v54  ;;  %v2636_v56 = vmul.f32 %v4906_v25, %v4906_v25  ;;  %v2639_v20 = vmul.f32 %v4903_v58, %v4903_v58 }
 0x8f6   : > { %v2585_v37 = vpop.xlane.xlu1 %2584 }
 0x8f7   : > { %v4915_v23 = vsub.f32 %v4820_v13, %v2605_v63  ;;  %v2608_v39 = vmul.f32 0.03125, %v2585_v37  ;;  %v2668_v28 = vsel %vm5071_vm3, %v2636_v56, 0.0  ;;  %v2677_v17 = vsel %vm5072_vm4, %v2639_v20, 0.0  ;;  %vm5086_vm3 = vmmov %vm5040_vm0 }
 0x8f8   : > { %2669 = vadd.xlane.f32.xlu1 %v2668_v28  ;;  %vm5087_vm4 = vmmov %vm5040_vm0 }
 0x8f9   : > { %v4920_v18 = vsub.f32 %v4830_v19, %v2608_v39  ;;  %2678 = vadd.xlane.f32.xlu0 %v2677_v17  ;;  %v2637_v60 = vmul.f32 %v4915_v23, %v4915_v23 }
 0x8fa   : > { %v2588_v48 = vpop.xlane.xlu0 %2587  ;;  %v2591_v61 = vpop.xlane.xlu1 %2590 }
 0x8fb   : > { %v2609_v2 = vmul.f32 0.03125, %v2588_v48  ;;  %v2610_v14 = vmul.f32 0.03125, %v2591_v61  ;;  %v2671_v13 = vsel %vm5073_vm5, %v2637_v60, 0.0  ;;  %v2640_v52 = vmul.f32 %v4920_v18, %v4920_v18  ;;  %vm5088_vm5 = vmmov %vm5040_vm0 }
 0x8fd   : > { %v4928_v22 = vsub.f32 %v4840_v8, %v2609_v2  ;;  %v4931_v46 = vsub.f32 %v4834_v41, %v2610_v14  ;;  %2672 = vadd.xlane.f32.xlu0 %v2671_v13  ;;  %v2680_v19 = vsel %vm5074_vm6, %v2640_v52, 0.0  ;;  %vm5089_vm6 = vmmov %vm5040_vm0 }
 0x8fe   : > { %v2594_v16 = vpop.xlane.xlu0 %2593  ;;  %2681 = vadd.xlane.f32.xlu1 %v2680_v19 }
 0x8ff   : > { %v2611_v35 = vmul.f32 0.03125, %v2594_v16  ;;  %v2641_v5 = vmul.f32 %v4928_v22, %v4928_v22  ;;  %v2642_v21 = vmul.f32 %v4931_v46, %v4931_v46 }
 0x901   : > { %v4939_v31 = vsub.f32 %v4842_v4, %v2611_v35  ;;  %v2683_v8 = vsel %vm5075_vm7, %v2641_v5, 0.0  ;;  %v2686_v41 = vsel %vm5076_vm8, %v2642_v21, 0.0  ;;  %vm5090_vm7 = vmmov %vm5040_vm0 }
 0x902   : > { %2684 = vadd.xlane.f32.xlu0 %v2683_v8  ;;  %2687 = vadd.xlane.f32.xlu1 %v2686_v41  ;;  %vm5091_vm8 = vmmov %vm5040_vm0 }
 0x903   : > { %v2643_v44 = vmul.f32 %v4939_v31, %v4939_v31 }
 0x905   : > { %v2689_v11 = vsel %vm5077_vm9, %v2643_v44, 0.0  ;;  %vm5092_vm9 = vmmov %vm5040_vm0 }
 0x906   : > { %2690 = vadd.xlane.f32.xlu0 %v2689_v11 }
 0x96a   : > { %v2652_v40 = vpop.xlane.xlu1 %2651 }
 0x96b   : > { %v2694_v0 = vmul.f32 0.03125, %v2652_v40 }
 0x96d   : > { %v2710_v57 = vadd.f32 1e-05, %v2694_v0 }
 0x96e   : > { %v2646_v9 = vpop.xlane.xlu1 %2645 }
 0x96f   : > { %3577 = vrsqrt.f32 %v2710_v57  ;;  %v2692_v4 = vmul.f32 0.03125, %v2646_v9 }
 0x971   : > { %v2708_v7 = vadd.f32 1e-05, %v2692_v4 }
 0x972   : > { %v2655_v50 = vpop.xlane.xlu0 %2654 }
 0x973   : > { %3579 = vrsqrt.f32 %v2708_v7  ;;  %v2695_v49 = vmul.f32 0.03125, %v2655_v50 }
 0x975   : > { %v2711_v1 = vadd.f32 1e-05, %v2695_v49  ;;  %v2664_v15 = vpop.xlane.xlu1 %2663 }
 0x976   : > { %v2698_v3 = vmul.f32 0.03125, %v2664_v15  ;;  %v2649_v62 = vpop.xlane.xlu0 %2648 }
 0x977   : > { %3581 = vrsqrt.f32 %v2711_v1  ;;  %v2693_v47 = vmul.f32 0.03125, %v2649_v62 }
 0x978   : > { %v2714_v29 = vadd.f32 1e-05, %v2698_v3 }
 0x979   : > { %v2709_v30 = vadd.f32 1e-05, %v2693_v47  ;;  %v2658_v24 = vpop.xlane.xlu1 %2657 }
 0x97a   : > { %3583 = vrsqrt.f32 %v2714_v29  ;;  %v2696_v34 = vmul.f32 0.03125, %v2658_v24  ;;  %v2667_v51 = vpop.xlane.xlu0 %2666 }
 0x97b   : > { %3585 = vrsqrt.f32 %v2709_v30  ;;  %v2699_v38 = vmul.f32 0.03125, %v2667_v51 }
 0x97c   : > { %v3578_v42 = vpop.eup %3577  ;;  %v2712_v6 = vadd.f32 1e-05, %v2696_v34 }
 0x97d   : > { %v2742_v36 = vmul.f32 %v3578_v42, %v4851_v43  ;;  %v2715_v53 = vadd.f32 1e-05, %v2699_v38  ;;  %v2676_v54 = vpop.xlane.xlu1 %2675 }
 0x97e   : > { %3587 = vrsqrt.f32 %v2712_v6  ;;  %v2702_v12 = vmul.f32 0.03125, %v2676_v54  ;;  %v2661_v63 = vpop.xlane.xlu0 %2660 }
 0x97f   : > { %2758 = vst.msk [vmem:[%s4950_s23 + $0x10] sm:$0xff] %vm5078_vm1, %v2742_v36  ;;  %3589 = vrsqrt.f32 %v2715_v53  ;;  %v2697_v56 = vmul.f32 0.03125, %v2661_v63 }
 0x980   : > { %v3580_v20 = vpop.eup %3579  ;;  %v2718_v37 = vadd.f32 1e-05, %v2702_v12 }
 0x981   : > { %v2740_v39 = vmul.f32 %v3580_v20, %v4856_v55  ;;  %v2713_v28 = vadd.f32 1e-05, %v2697_v56  ;;  %v2670_v17 = vpop.xlane.xlu1 %2669 }
 0x982   : > { %3591 = vrsqrt.f32 %v2718_v37  ;;  %v2700_v60 = vmul.f32 0.03125, %v2670_v17  ;;  %v2679_v43 = vpop.xlane.xlu0 %2678 }
 0x983   : > { %2756 = vst.msk [vmem:[%s4950_s23] sm:$0xff] %vm5079_vm10, %v2740_v39  ;;  %3593 = vrsqrt.f32 %v2713_v28  ;;  %v2703_v48 = vmul.f32 0.03125, %v2679_v43 }
 0x984   : > { %v3582_v61 = vpop.eup %3581  ;;  %v2716_v2 = vadd.f32 1e-05, %v2700_v60 }
 0x985   : > { %v2743_v14 = vmul.f32 %v3582_v61, %v4865_v10  ;;  %v2719_v13 = vadd.f32 1e-05, %v2703_v48 }
 0x986   : > { %3595 = vrsqrt.f32 %v2716_v2  ;;  %v2673_v52 = vpop.xlane.xlu0 %2672 }
 0x987   : > { %v3584_v55 = vpop.eup %3583  ;;  %2759 = vst.msk [vmem:[%s4950_s23 + $0x18] sm:$0xff] %vm5080_vm11, %v2743_v14  ;;  %3597 = vrsqrt.f32 %v2719_v13  ;;  %v2701_v19 = vmul.f32 0.03125, %v2673_v52  ;;  %v2682_v16 = vpop.xlane.xlu1 %2681 }
 0x988   : > { %v3586_v35 = vpop.eup %3585  ;;  %v2746_v5 = vmul.f32 %v3584_v55, %v4871_v45  ;;  %v2704_v21 = vmul.f32 0.03125, %v2682_v16 }
 0x989   : > { %v2741_v8 = vmul.f32 %v3586_v35, %v4862_v27  ;;  %v2717_v41 = vadd.f32 1e-05, %v2701_v19 }
 0x98a   : > { %2762 = vst.msk [vmem:[%s4950_s23 + $0x30] sm:$0xff] %vm5081_vm12, %v2746_v5  ;;  %v2720_v10 = vadd.f32 1e-05, %v2704_v21 }
 0x98b   : > { %v3588_v44 = vpop.eup %3587  ;;  %2757 = vst.msk [vmem:[%s4950_s23 + $0x8] sm:$0xff] %vm5082_vm13, %v2741_v8  ;;  %3599 = vrsqrt.f32 %v2717_v41  ;;  %v2685_v11 = vpop.xlane.xlu0 %2684 }
 0x98c   : > { %v2688_v40 = vpop.xlane.xlu1 %2687  ;;  %v3590_v0 = vpop.eup %3589  ;;  %v2744_v57 = vmul.f32 %v3588_v44, %v4882_v33  ;;  %3601 = vrsqrt.f32 %v2720_v10  ;;  %v2705_v45 = vmul.f32 0.03125, %v2685_v11 }
 0x98d   : > { %v2706_v9 = vmul.f32 0.03125, %v2688_v40  ;;  %v2747_v27 = vmul.f32 %v3590_v0, %v4879_v26 }
 0x98e   : > { %2760 = vst.msk [vmem:[%s4950_s23 + $0x20] sm:$0xff] %vm5083_vm14, %v2744_v57  ;;  %v2721_v4 = vadd.f32 1e-05, %v2705_v45 }
 0x98f   : > { %v2722_v7 = vadd.f32 1e-05, %v2706_v9  ;;  %v3592_v50 = vpop.eup %3591  ;;  %2763 = vst.msk [vmem:[%s4950_s23 + $0x38] sm:$0xff] %vm5084_vm15, %v2747_v27  ;;  %v2691_v49 = vpop.xlane.xlu0 %2690 }
 0x990   : > { %v3594_v1 = vpop.eup %3593  ;;  %v2750_v33 = vmul.f32 %v3592_v50, %v4894_v32  ;;  %3603 = vrsqrt.f32 %v2721_v4  ;;  %v2707_v15 = vmul.f32 0.03125, %v2691_v49 }
 0x991   : > { %v2745_v3 = vmul.f32 %v3594_v1, %v4891_v59  ;;  %3605 = vrsqrt.f32 %v2722_v7 }
 0x992   : > { %2766 = vst.msk [vmem:[%s4950_s23 + $0x50] sm:$0xff] %vm5085_vm2, %v2750_v33  ;;  %v2723_v26 = vadd.f32 1e-05, %v2707_v15 }
 0x993   : > { %v3596_v62 = vpop.eup %3595  ;;  %2761 = vst.msk [vmem:[%s4950_s23 + $0x28] sm:$0xff] %vm5040_vm0, %v2745_v3 }
 0x994   : > { %v3598_v47 = vpop.eup %3597  ;;  %v2748_v29 = vmul.f32 %v3596_v62, %v4906_v25  ;;  %3607 = vrsqrt.f32 %v2723_v26 }
 0x995   : > { %v2751_v32 = vmul.f32 %v3598_v47, %v4903_v58 }
 0x996   : > { %2764 = vst.msk [vmem:[%s4950_s23 + $0x40] sm:$0xff] %vm5086_vm3, %v2748_v29 }
 0x997   : > { %2767 = vst.msk [vmem:[%s4950_s23 + $0x58] sm:$0xff] %vm5087_vm4, %v2751_v32 }
 0x998   : > { %v3600_v59 = vpop.eup %3599 }
 0x999   : > { %v3602_v30 = vpop.eup %3601  ;;  %v2749_v24 = vmul.f32 %v3600_v59, %v4915_v23 }
 0x99a   : > { %v2752_v34 = vmul.f32 %v3602_v30, %v4920_v18 }
 0x99b   : > { %2765 = vst.msk [vmem:[%s4950_s23 + $0x48] sm:$0xff] %vm5088_vm5, %v2749_v24 }
 0x99c   : > { %2768 = vst.msk [vmem:[%s4950_s23 + $0x60] sm:$0xff] %vm5089_vm6, %v2752_v34 }
 0x99d   : > { %v3604_v25 = vpop.eup %3603 }
 0x99e   : > { %v3606_v51 = vpop.eup %3605  ;;  %v2753_v38 = vmul.f32 %v3604_v25, %v4928_v22 }
 0x99f   : > { %v2754_v58 = vmul.f32 %v3606_v51, %v4931_v46 }
 0x9a0   : > { %2769 = vst.msk [vmem:[%s4950_s23 + $0x68] sm:$0xff] %vm5090_vm7, %v2753_v38 }
 0x9a1   : > { %v3608_v42 = vpop.eup %3607  ;;  %2770 = vst.msk [vmem:[%s4950_s23 + $0x70] sm:$0xff] %vm5091_vm8, %v2754_v58 }
 0x9a2   : > { %v2755_v6 = vmul.f32 %v3608_v42, %v4939_v31 }
 0x9a4   : > { %2771 = vst.msk [vmem:[%s4950_s23 + $0x78] sm:$0xff] %vm5092_vm9, %v2755_v6 }
 0x9a5 PF: > { %s19_s30 = sadd.s32 1, %s3623_s30  }
 0x9a6   : > { %p16_p4 = scmp.ge.s32.totalorder %s19_s30, 4  }
 0x9a8   :  { %18 = sbr.rel (!%p16_p4) target bundleno = 1 (0x1), region = 89 }

</bundles_post_ra>
